<compile_context>
chip_gen: v7x
topology: tpu7x:2x2x1
jax: 0.10.0
libtpu: 0.0.40
codegen_flags: <defaults>
</compile_context>

<pallas_src>
import functools
import math

import jax
import jax.numpy as jnp
from jax.experimental import pallas as pl
from jax.experimental.pallas import tpu as pltpu


def _bgat_fused_kernel(beta_ref, x_ref, w_ref, a_ref, o_ref, *, H, F, TB, alpha):
    # beta_ref: (H,) in SMEM (whole array)
    # x_ref:    (TB, N, C)   batch tile
    # w_ref:    (H, C, F)    all heads' projections (resident across steps)
    # a_ref:    (H, F, 2)    all heads' packed attention vectors [a1 | a2]
    # o_ref:    (TB, N, H*F) concat-layout output tile (lane-dense)
    N = x_ref.shape[1]
    C = x_ref.shape[2]
    x_flat = x_ref[...].reshape(TB * N, C)                          # (TB*N, C)

    per_batch = [[] for _ in range(TB)]
    for hd in range(H):                                             # static unroll over heads
        w = w_ref[hd]                                               # (C, F)
        a_hd = a_ref[hd]                                            # (F, 2)
        beta = beta_ref[hd]                                         # scalar (SMEM)

        # One big projection for the whole batch tile (MXU).
        h_all = jnp.dot(x_flat, w, preferred_element_type=jnp.float32)    # (TB*N, F)
        # Packed attention projection: col 0 = h.a1, col 1 = h.a2 (single matmul).
        f_all = jnp.dot(h_all, a_hd, preferred_element_type=jnp.float32)  # (TB*N, 2)

        h3 = h_all.reshape(TB, N, F)
        f3 = f_all.reshape(TB, N, 2)

        for tb in range(TB):                                        # static unroll over batch tile
            h = h3[tb]                                              # (N, F)
            f = f3[tb]                                              # (N, 2)
            # e[i, j] = a . concat(h_i, h_j) = (h.a1)_i + (h.a2)_j
            e = f[:, 0:1] + f[:, 1:2].T                             # (N, N)
            e = jnp.where(e > 0, e, alpha * e)                      # LeakyReLU(alpha)

            # Row softmax (dim=2 in the torch code), max-stabilized.
            e = e - jnp.max(e, axis=-1, keepdims=True)
            p = jnp.exp(e)
            attn = p / jnp.sum(p, axis=-1, keepdims=True)           # (N, N)

            # dropout(p=0, eval) is a no-op.
            h_prime = jnp.dot(attn, h, preferred_element_type=jnp.float32)  # (N, F)
            z = h_prime + beta * h

            # ELU: negative branch expm1(z) == tanh(z/2) * (exp(z) + 1), evaluated
            # on min(z, 0) so the unselected branch never produces inf.
            zn = jnp.minimum(z, 0.0)
            elu_neg = jnp.tanh(0.5 * zn) * (jnp.exp(zn) + 1.0)
            per_batch[tb].append(jnp.where(z > 0, z, elu_neg))

    # Lane-dense stores: one (N, H*F) slab per batch row, already in torch.cat order.
    for tb in range(TB):
        o_ref[tb] = jnp.concatenate(per_batch[tb], axis=-1).astype(o_ref.dtype)


def _pick_batch_tile(B, N):
    """Largest batch tile that amortizes per-step overhead while keeping >=2 grid
    steps (so the v7x megacore has something to shard) and bounding VMEM."""
    max_rows = 1024                         # cap TB*N rows resident per step
    tb = max(1, min(B, max_rows // max(N, 1)))
    while B % tb != 0:
        tb -= 1
    if B >= 2 and B // tb < 2:
        tb = max(1, B // 2)
        while B % tb != 0:
            tb -= 1
    return tb


def nheads_bgat_forward(x, W, a, beta, *, alpha=0.2, aggregate="concat", batch_tile=None):
    """x: (B, N, C); W: (H, C, F); a: (H, 2F, 1); beta: (H,). Returns (B, N, H*F)."""
    H, C, F = W.shape
    B, N, C_x = x.shape
    assert C_x == C and F == C, "BGATLayer's reshape requires out_features == in_features"

    if aggregate == "mean":
        # TODO(synk): the PyTorch 'mean' branch calls .squeeze(3) on a rank-3 tensor
        # and raises at runtime; it has no well-defined semantics to reproduce.
        raise NotImplementedError("'mean' aggregation is broken in the reference module")
    if aggregate != "concat":
        raise ValueError(f"unknown aggregate mode: {aggregate!r}")

    # Pack a = [a1; a2] (2F, 1) into (F, 2) so the projection is one matmul.
    a_packed = jnp.concatenate([a[:, :F, :], a[:, F:, :]], axis=2)  # (H, F, 2)

    TB = batch_tile if batch_tile is not None else _pick_batch_tile(B, N)
    assert B % TB == 0, (B, TB)

    kernel = functools.partial(_bgat_fused_kernel, H=H, F=F, TB=TB, alpha=alpha)

    out = pl.pallas_call(
        kernel,
        out_shape=jax.ShapeDtypeStruct((B, N, H * F), jnp.float32),
        grid_spec=pltpu.PrefetchScalarGridSpec(
            num_scalar_prefetch=0,
            grid=(B // TB,),
            in_specs=[
                pl.BlockSpec(memory_space=pltpu.MemorySpace.SMEM),   # beta (whole array)
                pl.BlockSpec((TB, N, C), lambda b: (b, 0, 0)),       # x batch tile
                pl.BlockSpec((H, C, F), lambda b: (0, 0, 0)),        # W (all heads, resident)
                pl.BlockSpec((H, F, 2), lambda b: (0, 0, 0)),        # a packed (all heads)
            ],
            out_specs=pl.BlockSpec((TB, N, H * F), lambda b: (b, 0, 0)),
        ),
        compiler_params=pltpu.CompilerParams(dimension_semantics=("parallel",)),
    )(beta, x, W, a_packed)

    return out  # already (B, N, H*F) in concat order; no post-kernel transpose


# ---------------- deterministic parameter init (xavier_uniform, gain=1.414) ----------------
def _xavier_uniform(key, shape, fan_in, fan_out, gain=1.414):
    limit = gain * math.sqrt(6.0 / (fan_in + fan_out))
    return jax.random.uniform(key, shape, jnp.float32, -limit, limit)


# ---------------- pure-JAX reference for correctness ----------------
def _ref_forward(x, W, a, beta, alpha=0.2):
    H, C, F = W.shape
    outs = []
    for hd in range(H):
        h = jnp.einsum("bnc,cf->bnf", x, W[hd])
        f1 = jnp.einsum("bnf,fo->bno", h, a[hd, :F, :])       # (B, N, 1)
        f2 = jnp.einsum("bnf,fo->bno", h, a[hd, F:, :])       # (B, N, 1)
        e = f1 + jnp.swapaxes(f2, 1, 2)                       # (B, N, N)
        e = jnp.where(e > 0, e, alpha * e)
        attn = jax.nn.softmax(e, axis=-1)
        h_prime = jnp.einsum("bij,bjf->bif", attn, h)
        z = h_prime + beta[hd] * h
        outs.append(jnp.where(z > 0, z, jnp.expm1(jnp.minimum(z, 0.0))))  # ELU (expm1)
    return jnp.concatenate(outs, axis=2)


if __name__ == "__main__":
    B, N, C = 4, 8, 32
    F = C          # required by the reference module's reshape
    H = 4          # nheads -> H*F = 128 (lane-dense output)
    alpha = 0.2

    key = jax.random.PRNGKey(0)
    kx, kw, ka = jax.random.split(key, 3)

    x = jax.random.normal(kx, (B, N, C), jnp.float32)
    W = _xavier_uniform(kw, (H, C, F), fan_in=C, fan_out=F)
    a = _xavier_uniform(ka, (H, 2 * F, 1), fan_in=2 * F, fan_out=1)
    beta = jnp.linspace(0.5, 1.5, H).astype(jnp.float32)   # per-head beta (init is ones in torch)

    out = nheads_bgat_forward(x, W, a, beta, alpha=alpha, aggregate="concat")
    out = jax.block_until_ready(out)

    ref = _ref_forward(x, W, a, beta, alpha=alpha)
    assert out.shape == (B, N, H * F), out.shape
    assert jnp.allclose(out, ref, atol=1e-5, rtol=1e-5), float(jnp.max(jnp.abs(out - ref)))

    print("KERNEL_OK")
</pallas_src>

<mosaic_0001>
module attributes {stable_mosaic.version = 11 : i64} {
  func.func @_bgat_fused_kernel(%arg0: i32, %arg1: memref<4xf32, #tpu.memory_space<smem>>, %arg2: memref<2x8x32xf32, #tpu.memory_space<vmem>>, %arg3: memref<4x32x32xf32, #tpu.memory_space<vmem>>, %arg4: memref<4x32x2xf32, #tpu.memory_space<vmem>>, %arg5: memref<2x8x128xf32, #tpu.memory_space<vmem>>) attributes {dimension_semantics = [#tpu.dimension_semantics<parallel>], iteration_bounds = array<i64: 2>, scalar_prefetch = 0 : i64, scratch_operands = 0 : i64, tpu.core_type = #tpu.core_type<tc>, window_params = [{transform_indices = @transform_0, window_bounds = array<i64: 4>}, {transform_indices = @transform_1, window_bounds = array<i64: 2, 8, 32>}, {pipeline_mode = #tpu.pipeline_mode<synchronous>, transform_indices = @transform_2, window_bounds = array<i64: 4, 32, 32>}, {pipeline_mode = #tpu.pipeline_mode<synchronous>, transform_indices = @transform_3, window_bounds = array<i64: 4, 32, 2>}, {transform_indices = @transform_4, window_bounds = array<i64: 2, 8, 128>}]} {
    %c0 = arith.constant 0 : index
    %c0_0 = arith.constant 0 : index
    %c0_1 = arith.constant 0 : index
    %0 = vector.load %arg2[%c0, %c0_0, %c0_1] : memref<2x8x32xf32, #tpu.memory_space<vmem>>, vector<2x8x32xf32>
    %1 = vector.shape_cast %0 : vector<2x8x32xf32> to vector<16x32xf32>
    %c0_2 = arith.constant 0 : index
    %c0_3 = arith.constant 0 : index
    %c0_4 = arith.constant 0 : index
    %2 = vector.load %arg3[%c0_2, %c0_3, %c0_4] : memref<4x32x32xf32, #tpu.memory_space<vmem>>, vector<1x32x32xf32>
    %3 = vector.shape_cast %2 : vector<1x32x32xf32> to vector<32x32xf32>
    %c0_5 = arith.constant 0 : index
    %c0_6 = arith.constant 0 : index
    %c0_7 = arith.constant 0 : index
    %4 = vector.load %arg4[%c0_5, %c0_6, %c0_7] : memref<4x32x2xf32, #tpu.memory_space<vmem>>, vector<1x32x2xf32>
    %5 = vector.shape_cast %4 : vector<1x32x2xf32> to vector<32x2xf32>
    %c0_8 = arith.constant 0 : index
    %6 = memref.load %arg1[%c0_8] : memref<4xf32, #tpu.memory_space<smem>>
    %cst = arith.constant dense<0.000000e+00> : vector<16x32xf32>
    %7 = tpu.matmul %1, %3, %cst {dimension_numbers = #tpu.dot_dimension_numbers<[1], [0], [0], [1], [0, 0, 1, 1], [], []>} : vector<16x32xf32>, vector<32x32xf32>, vector<16x32xf32> -> vector<16x32xf32>
    %cst_9 = arith.constant dense<0.000000e+00> : vector<16x2xf32>
    %8 = tpu.matmul %7, %5, %cst_9 {dimension_numbers = #tpu.dot_dimension_numbers<[1], [0], [0], [1], [0, 0, 1, 1], [], []>} : vector<16x32xf32>, vector<32x2xf32>, vector<16x2xf32> -> vector<16x2xf32>
    %9 = vector.shape_cast %7 : vector<16x32xf32> to vector<2x8x32xf32>
    %10 = vector.shape_cast %8 : vector<16x2xf32> to vector<2x8x2xf32>
    %11 = vector.extract_strided_slice %9 {offsets = [0, 0, 0], sizes = [1, 8, 32], strides = [1, 1, 1]} : vector<2x8x32xf32> to vector<1x8x32xf32>
    %12 = vector.shape_cast %11 : vector<1x8x32xf32> to vector<8x32xf32>
    %13 = vector.extract_strided_slice %10 {offsets = [0, 0, 0], sizes = [1, 8, 2], strides = [1, 1, 1]} : vector<2x8x2xf32> to vector<1x8x2xf32>
    %14 = vector.shape_cast %13 : vector<1x8x2xf32> to vector<8x2xf32>
    %15 = vector.extract_strided_slice %14 {offsets = [0, 0], sizes = [8, 1], strides = [1, 1]} : vector<8x2xf32> to vector<8x1xf32>
    %16 = vector.extract_strided_slice %14 {offsets = [0, 1], sizes = [8, 1], strides = [1, 1]} : vector<8x2xf32> to vector<8x1xf32>
    %17 = tpu.transpose %16, [1, 0] : vector<8x1xf32> -> vector<1x8xf32>
    %18 = vector.broadcast %15 : vector<8x1xf32> to vector<8x8xf32>
    %19 = vector.broadcast %17 : vector<1x8xf32> to vector<8x8xf32>
    %20 = arith.addf %18, %19 : vector<8x8xf32>
    %cst_10 = arith.constant 0.000000e+00 : f32
    %21 = vector.broadcast %cst_10 : f32 to vector<8x8xf32>
    %22 = arith.cmpf ogt, %20, %21 : vector<8x8xf32>
    %cst_11 = arith.constant 2.000000e-01 : f32
    %23 = vector.broadcast %cst_11 : f32 to vector<8x8xf32>
    %24 = arith.mulf %23, %20 : vector<8x8xf32>
    %25 = arith.select %22, %20, %24 : vector<8x8xi1>, vector<8x8xf32>
    %cst_12 = arith.constant dense<0xFF800000> : vector<8xf32>
    %26 = vector.multi_reduction <maximumf>, %25, %cst_12 [1] : vector<8x8xf32> to vector<8xf32>
    %27 = vector.shape_cast %26 : vector<8xf32> to vector<8x1xf32>
    %28 = vector.broadcast %27 : vector<8x1xf32> to vector<8x8xf32>
    %29 = arith.subf %25, %28 : vector<8x8xf32>
    %30 = math.exp %29 : vector<8x8xf32>
    %cst_13 = arith.constant dense<0.000000e+00> : vector<8xf32>
    %31 = vector.multi_reduction <add>, %30, %cst_13 [1] : vector<8x8xf32> to vector<8xf32>
    %32 = vector.shape_cast %31 : vector<8xf32> to vector<8x1xf32>
    %33 = vector.broadcast %32 : vector<8x1xf32> to vector<8x8xf32>
    %34 = arith.divf %30, %33 : vector<8x8xf32>
    %cst_14 = arith.constant dense<0.000000e+00> : vector<8x32xf32>
    %35 = tpu.matmul %34, %12, %cst_14 {dimension_numbers = #tpu.dot_dimension_numbers<[1], [0], [0], [1], [0, 0, 1, 1], [], []>} : vector<8x8xf32>, vector<8x32xf32>, vector<8x32xf32> -> vector<8x32xf32>
    %36 = vector.broadcast %6 : f32 to vector<8x32xf32>
    %37 = arith.mulf %36, %12 : vector<8x32xf32>
    %38 = arith.addf %35, %37 : vector<8x32xf32>
    %cst_15 = arith.constant 0.000000e+00 : f32
    %39 = vector.broadcast %cst_15 : f32 to vector<8x32xf32>
    %40 = arith.minimumf %38, %39 : vector<8x32xf32>
    %cst_16 = arith.constant 5.000000e-01 : f32
    %41 = vector.broadcast %cst_16 : f32 to vector<8x32xf32>
    %42 = arith.mulf %41, %40 : vector<8x32xf32>
    %43 = math.tanh %42 : vector<8x32xf32>
    %44 = math.exp %40 : vector<8x32xf32>
    %cst_17 = arith.constant 1.000000e+00 : f32
    %45 = vector.broadcast %cst_17 : f32 to vector<8x32xf32>
    %46 = arith.addf %44, %45 : vector<8x32xf32>
    %47 = arith.mulf %43, %46 : vector<8x32xf32>
    %cst_18 = arith.constant 0.000000e+00 : f32
    %48 = vector.broadcast %cst_18 : f32 to vector<8x32xf32>
    %49 = arith.cmpf ogt, %38, %48 : vector<8x32xf32>
    %50 = arith.select %49, %38, %47 : vector<8x32xi1>, vector<8x32xf32>
    %51 = vector.extract_strided_slice %9 {offsets = [1, 0, 0], sizes = [1, 8, 32], strides = [1, 1, 1]} : vector<2x8x32xf32> to vector<1x8x32xf32>
    %52 = vector.shape_cast %51 : vector<1x8x32xf32> to vector<8x32xf32>
    %53 = vector.extract_strided_slice %10 {offsets = [1, 0, 0], sizes = [1, 8, 2], strides = [1, 1, 1]} : vector<2x8x2xf32> to vector<1x8x2xf32>
    %54 = vector.shape_cast %53 : vector<1x8x2xf32> to vector<8x2xf32>
    %55 = vector.extract_strided_slice %54 {offsets = [0, 0], sizes = [8, 1], strides = [1, 1]} : vector<8x2xf32> to vector<8x1xf32>
    %56 = vector.extract_strided_slice %54 {offsets = [0, 1], sizes = [8, 1], strides = [1, 1]} : vector<8x2xf32> to vector<8x1xf32>
    %57 = tpu.transpose %56, [1, 0] : vector<8x1xf32> -> vector<1x8xf32>
    %58 = vector.broadcast %55 : vector<8x1xf32> to vector<8x8xf32>
    %59 = vector.broadcast %57 : vector<1x8xf32> to vector<8x8xf32>
    %60 = arith.addf %58, %59 : vector<8x8xf32>
    %cst_19 = arith.constant 0.000000e+00 : f32
    %61 = vector.broadcast %cst_19 : f32 to vector<8x8xf32>
    %62 = arith.cmpf ogt, %60, %61 : vector<8x8xf32>
    %cst_20 = arith.constant 2.000000e-01 : f32
    %63 = vector.broadcast %cst_20 : f32 to vector<8x8xf32>
    %64 = arith.mulf %63, %60 : vector<8x8xf32>
    %65 = arith.select %62, %60, %64 : vector<8x8xi1>, vector<8x8xf32>
    %cst_21 = arith.constant dense<0xFF800000> : vector<8xf32>
    %66 = vector.multi_reduction <maximumf>, %65, %cst_21 [1] : vector<8x8xf32> to vector<8xf32>
    %67 = vector.shape_cast %66 : vector<8xf32> to vector<8x1xf32>
    %68 = vector.broadcast %67 : vector<8x1xf32> to vector<8x8xf32>
    %69 = arith.subf %65, %68 : vector<8x8xf32>
    %70 = math.exp %69 : vector<8x8xf32>
    %cst_22 = arith.constant dense<0.000000e+00> : vector<8xf32>
    %71 = vector.multi_reduction <add>, %70, %cst_22 [1] : vector<8x8xf32> to vector<8xf32>
    %72 = vector.shape_cast %71 : vector<8xf32> to vector<8x1xf32>
    %73 = vector.broadcast %72 : vector<8x1xf32> to vector<8x8xf32>
    %74 = arith.divf %70, %73 : vector<8x8xf32>
    %cst_23 = arith.constant dense<0.000000e+00> : vector<8x32xf32>
    %75 = tpu.matmul %74, %52, %cst_23 {dimension_numbers = #tpu.dot_dimension_numbers<[1], [0], [0], [1], [0, 0, 1, 1], [], []>} : vector<8x8xf32>, vector<8x32xf32>, vector<8x32xf32> -> vector<8x32xf32>
    %76 = vector.broadcast %6 : f32 to vector<8x32xf32>
    %77 = arith.mulf %76, %52 : vector<8x32xf32>
    %78 = arith.addf %75, %77 : vector<8x32xf32>
    %cst_24 = arith.constant 0.000000e+00 : f32
    %79 = vector.broadcast %cst_24 : f32 to vector<8x32xf32>
    %80 = arith.minimumf %78, %79 : vector<8x32xf32>
    %cst_25 = arith.constant 5.000000e-01 : f32
    %81 = vector.broadcast %cst_25 : f32 to vector<8x32xf32>
    %82 = arith.mulf %81, %80 : vector<8x32xf32>
    %83 = math.tanh %82 : vector<8x32xf32>
    %84 = math.exp %80 : vector<8x32xf32>
    %cst_26 = arith.constant 1.000000e+00 : f32
    %85 = vector.broadcast %cst_26 : f32 to vector<8x32xf32>
    %86 = arith.addf %84, %85 : vector<8x32xf32>
    %87 = arith.mulf %83, %86 : vector<8x32xf32>
    %cst_27 = arith.constant 0.000000e+00 : f32
    %88 = vector.broadcast %cst_27 : f32 to vector<8x32xf32>
    %89 = arith.cmpf ogt, %78, %88 : vector<8x32xf32>
    %90 = arith.select %89, %78, %87 : vector<8x32xi1>, vector<8x32xf32>
    %c1 = arith.constant 1 : index
    %c0_28 = arith.constant 0 : index
    %c0_29 = arith.constant 0 : index
    %91 = vector.load %arg3[%c1, %c0_28, %c0_29] : memref<4x32x32xf32, #tpu.memory_space<vmem>>, vector<1x32x32xf32>
    %92 = vector.shape_cast %91 : vector<1x32x32xf32> to vector<32x32xf32>
    %c1_30 = arith.constant 1 : index
    %c0_31 = arith.constant 0 : index
    %c0_32 = arith.constant 0 : index
    %93 = vector.load %arg4[%c1_30, %c0_31, %c0_32] : memref<4x32x2xf32, #tpu.memory_space<vmem>>, vector<1x32x2xf32>
    %94 = vector.shape_cast %93 : vector<1x32x2xf32> to vector<32x2xf32>
    %c1_33 = arith.constant 1 : index
    %95 = memref.load %arg1[%c1_33] : memref<4xf32, #tpu.memory_space<smem>>
    %cst_34 = arith.constant dense<0.000000e+00> : vector<16x32xf32>
    %96 = tpu.matmul %1, %92, %cst_34 {dimension_numbers = #tpu.dot_dimension_numbers<[1], [0], [0], [1], [0, 0, 1, 1], [], []>} : vector<16x32xf32>, vector<32x32xf32>, vector<16x32xf32> -> vector<16x32xf32>
    %cst_35 = arith.constant dense<0.000000e+00> : vector<16x2xf32>
    %97 = tpu.matmul %96, %94, %cst_35 {dimension_numbers = #tpu.dot_dimension_numbers<[1], [0], [0], [1], [0, 0, 1, 1], [], []>} : vector<16x32xf32>, vector<32x2xf32>, vector<16x2xf32> -> vector<16x2xf32>
    %98 = vector.shape_cast %96 : vector<16x32xf32> to vector<2x8x32xf32>
    %99 = vector.shape_cast %97 : vector<16x2xf32> to vector<2x8x2xf32>
    %100 = vector.extract_strided_slice %98 {offsets = [0, 0, 0], sizes = [1, 8, 32], strides = [1, 1, 1]} : vector<2x8x32xf32> to vector<1x8x32xf32>
    %101 = vector.shape_cast %100 : vector<1x8x32xf32> to vector<8x32xf32>
    %102 = vector.extract_strided_slice %99 {offsets = [0, 0, 0], sizes = [1, 8, 2], strides = [1, 1, 1]} : vector<2x8x2xf32> to vector<1x8x2xf32>
    %103 = vector.shape_cast %102 : vector<1x8x2xf32> to vector<8x2xf32>
    %104 = vector.extract_strided_slice %103 {offsets = [0, 0], sizes = [8, 1], strides = [1, 1]} : vector<8x2xf32> to vector<8x1xf32>
    %105 = vector.extract_strided_slice %103 {offsets = [0, 1], sizes = [8, 1], strides = [1, 1]} : vector<8x2xf32> to vector<8x1xf32>
    %106 = tpu.transpose %105, [1, 0] : vector<8x1xf32> -> vector<1x8xf32>
    %107 = vector.broadcast %104 : vector<8x1xf32> to vector<8x8xf32>
    %108 = vector.broadcast %106 : vector<1x8xf32> to vector<8x8xf32>
    %109 = arith.addf %107, %108 : vector<8x8xf32>
    %cst_36 = arith.constant 0.000000e+00 : f32
    %110 = vector.broadcast %cst_36 : f32 to vector<8x8xf32>
    %111 = arith.cmpf ogt, %109, %110 : vector<8x8xf32>
    %cst_37 = arith.constant 2.000000e-01 : f32
    %112 = vector.broadcast %cst_37 : f32 to vector<8x8xf32>
    %113 = arith.mulf %112, %109 : vector<8x8xf32>
    %114 = arith.select %111, %109, %113 : vector<8x8xi1>, vector<8x8xf32>
    %cst_38 = arith.constant dense<0xFF800000> : vector<8xf32>
    %115 = vector.multi_reduction <maximumf>, %114, %cst_38 [1] : vector<8x8xf32> to vector<8xf32>
    %116 = vector.shape_cast %115 : vector<8xf32> to vector<8x1xf32>
    %117 = vector.broadcast %116 : vector<8x1xf32> to vector<8x8xf32>
    %118 = arith.subf %114, %117 : vector<8x8xf32>
    %119 = math.exp %118 : vector<8x8xf32>
    %cst_39 = arith.constant dense<0.000000e+00> : vector<8xf32>
    %120 = vector.multi_reduction <add>, %119, %cst_39 [1] : vector<8x8xf32> to vector<8xf32>
    %121 = vector.shape_cast %120 : vector<8xf32> to vector<8x1xf32>
    %122 = vector.broadcast %121 : vector<8x1xf32> to vector<8x8xf32>
    %123 = arith.divf %119, %122 : vector<8x8xf32>
    %cst_40 = arith.constant dense<0.000000e+00> : vector<8x32xf32>
    %124 = tpu.matmul %123, %101, %cst_40 {dimension_numbers = #tpu.dot_dimension_numbers<[1], [0], [0], [1], [0, 0, 1, 1], [], []>} : vector<8x8xf32>, vector<8x32xf32>, vector<8x32xf32> -> vector<8x32xf32>
    %125 = vector.broadcast %95 : f32 to vector<8x32xf32>
    %126 = arith.mulf %125, %101 : vector<8x32xf32>
    %127 = arith.addf %124, %126 : vector<8x32xf32>
    %cst_41 = arith.constant 0.000000e+00 : f32
    %128 = vector.broadcast %cst_41 : f32 to vector<8x32xf32>
    %129 = arith.minimumf %127, %128 : vector<8x32xf32>
    %cst_42 = arith.constant 5.000000e-01 : f32
    %130 = vector.broadcast %cst_42 : f32 to vector<8x32xf32>
    %131 = arith.mulf %130, %129 : vector<8x32xf32>
    %132 = math.tanh %131 : vector<8x32xf32>
    %133 = math.exp %129 : vector<8x32xf32>
    %cst_43 = arith.constant 1.000000e+00 : f32
    %134 = vector.broadcast %cst_43 : f32 to vector<8x32xf32>
    %135 = arith.addf %133, %134 : vector<8x32xf32>
    %136 = arith.mulf %132, %135 : vector<8x32xf32>
    %cst_44 = arith.constant 0.000000e+00 : f32
    %137 = vector.broadcast %cst_44 : f32 to vector<8x32xf32>
    %138 = arith.cmpf ogt, %127, %137 : vector<8x32xf32>
    %139 = arith.select %138, %127, %136 : vector<8x32xi1>, vector<8x32xf32>
    %140 = vector.extract_strided_slice %98 {offsets = [1, 0, 0], sizes = [1, 8, 32], strides = [1, 1, 1]} : vector<2x8x32xf32> to vector<1x8x32xf32>
    %141 = vector.shape_cast %140 : vector<1x8x32xf32> to vector<8x32xf32>
    %142 = vector.extract_strided_slice %99 {offsets = [1, 0, 0], sizes = [1, 8, 2], strides = [1, 1, 1]} : vector<2x8x2xf32> to vector<1x8x2xf32>
    %143 = vector.shape_cast %142 : vector<1x8x2xf32> to vector<8x2xf32>
    %144 = vector.extract_strided_slice %143 {offsets = [0, 0], sizes = [8, 1], strides = [1, 1]} : vector<8x2xf32> to vector<8x1xf32>
    %145 = vector.extract_strided_slice %143 {offsets = [0, 1], sizes = [8, 1], strides = [1, 1]} : vector<8x2xf32> to vector<8x1xf32>
    %146 = tpu.transpose %145, [1, 0] : vector<8x1xf32> -> vector<1x8xf32>
    %147 = vector.broadcast %144 : vector<8x1xf32> to vector<8x8xf32>
    %148 = vector.broadcast %146 : vector<1x8xf32> to vector<8x8xf32>
    %149 = arith.addf %147, %148 : vector<8x8xf32>
    %cst_45 = arith.constant 0.000000e+00 : f32
    %150 = vector.broadcast %cst_45 : f32 to vector<8x8xf32>
    %151 = arith.cmpf ogt, %149, %150 : vector<8x8xf32>
    %cst_46 = arith.constant 2.000000e-01 : f32
    %152 = vector.broadcast %cst_46 : f32 to vector<8x8xf32>
    %153 = arith.mulf %152, %149 : vector<8x8xf32>
    %154 = arith.select %151, %149, %153 : vector<8x8xi1>, vector<8x8xf32>
    %cst_47 = arith.constant dense<0xFF800000> : vector<8xf32>
    %155 = vector.multi_reduction <maximumf>, %154, %cst_47 [1] : vector<8x8xf32> to vector<8xf32>
    %156 = vector.shape_cast %155 : vector<8xf32> to vector<8x1xf32>
    %157 = vector.broadcast %156 : vector<8x1xf32> to vector<8x8xf32>
    %158 = arith.subf %154, %157 : vector<8x8xf32>
    %159 = math.exp %158 : vector<8x8xf32>
    %cst_48 = arith.constant dense<0.000000e+00> : vector<8xf32>
    %160 = vector.multi_reduction <add>, %159, %cst_48 [1] : vector<8x8xf32> to vector<8xf32>
    %161 = vector.shape_cast %160 : vector<8xf32> to vector<8x1xf32>
    %162 = vector.broadcast %161 : vector<8x1xf32> to vector<8x8xf32>
    %163 = arith.divf %159, %162 : vector<8x8xf32>
    %cst_49 = arith.constant dense<0.000000e+00> : vector<8x32xf32>
    %164 = tpu.matmul %163, %141, %cst_49 {dimension_numbers = #tpu.dot_dimension_numbers<[1], [0], [0], [1], [0, 0, 1, 1], [], []>} : vector<8x8xf32>, vector<8x32xf32>, vector<8x32xf32> -> vector<8x32xf32>
    %165 = vector.broadcast %95 : f32 to vector<8x32xf32>
    %166 = arith.mulf %165, %141 : vector<8x32xf32>
    %167 = arith.addf %164, %166 : vector<8x32xf32>
    %cst_50 = arith.constant 0.000000e+00 : f32
    %168 = vector.broadcast %cst_50 : f32 to vector<8x32xf32>
    %169 = arith.minimumf %167, %168 : vector<8x32xf32>
    %cst_51 = arith.constant 5.000000e-01 : f32
    %170 = vector.broadcast %cst_51 : f32 to vector<8x32xf32>
    %171 = arith.mulf %170, %169 : vector<8x32xf32>
    %172 = math.tanh %171 : vector<8x32xf32>
    %173 = math.exp %169 : vector<8x32xf32>
    %cst_52 = arith.constant 1.000000e+00 : f32
    %174 = vector.broadcast %cst_52 : f32 to vector<8x32xf32>
    %175 = arith.addf %173, %174 : vector<8x32xf32>
    %176 = arith.mulf %172, %175 : vector<8x32xf32>
    %cst_53 = arith.constant 0.000000e+00 : f32
    %177 = vector.broadcast %cst_53 : f32 to vector<8x32xf32>
    %178 = arith.cmpf ogt, %167, %177 : vector<8x32xf32>
    %179 = arith.select %178, %167, %176 : vector<8x32xi1>, vector<8x32xf32>
    %c2 = arith.constant 2 : index
    %c0_54 = arith.constant 0 : index
    %c0_55 = arith.constant 0 : index
    %180 = vector.load %arg3[%c2, %c0_54, %c0_55] : memref<4x32x32xf32, #tpu.memory_space<vmem>>, vector<1x32x32xf32>
    %181 = vector.shape_cast %180 : vector<1x32x32xf32> to vector<32x32xf32>
    %c2_56 = arith.constant 2 : index
    %c0_57 = arith.constant 0 : index
    %c0_58 = arith.constant 0 : index
    %182 = vector.load %arg4[%c2_56, %c0_57, %c0_58] : memref<4x32x2xf32, #tpu.memory_space<vmem>>, vector<1x32x2xf32>
    %183 = vector.shape_cast %182 : vector<1x32x2xf32> to vector<32x2xf32>
    %c2_59 = arith.constant 2 : index
    %184 = memref.load %arg1[%c2_59] : memref<4xf32, #tpu.memory_space<smem>>
    %cst_60 = arith.constant dense<0.000000e+00> : vector<16x32xf32>
    %185 = tpu.matmul %1, %181, %cst_60 {dimension_numbers = #tpu.dot_dimension_numbers<[1], [0], [0], [1], [0, 0, 1, 1], [], []>} : vector<16x32xf32>, vector<32x32xf32>, vector<16x32xf32> -> vector<16x32xf32>
    %cst_61 = arith.constant dense<0.000000e+00> : vector<16x2xf32>
    %186 = tpu.matmul %185, %183, %cst_61 {dimension_numbers = #tpu.dot_dimension_numbers<[1], [0], [0], [1], [0, 0, 1, 1], [], []>} : vector<16x32xf32>, vector<32x2xf32>, vector<16x2xf32> -> vector<16x2xf32>
    %187 = vector.shape_cast %185 : vector<16x32xf32> to vector<2x8x32xf32>
    %188 = vector.shape_cast %186 : vector<16x2xf32> to vector<2x8x2xf32>
    %189 = vector.extract_strided_slice %187 {offsets = [0, 0, 0], sizes = [1, 8, 32], strides = [1, 1, 1]} : vector<2x8x32xf32> to vector<1x8x32xf32>
    %190 = vector.shape_cast %189 : vector<1x8x32xf32> to vector<8x32xf32>
    %191 = vector.extract_strided_slice %188 {offsets = [0, 0, 0], sizes = [1, 8, 2], strides = [1, 1, 1]} : vector<2x8x2xf32> to vector<1x8x2xf32>
    %192 = vector.shape_cast %191 : vector<1x8x2xf32> to vector<8x2xf32>
    %193 = vector.extract_strided_slice %192 {offsets = [0, 0], sizes = [8, 1], strides = [1, 1]} : vector<8x2xf32> to vector<8x1xf32>
    %194 = vector.extract_strided_slice %192 {offsets = [0, 1], sizes = [8, 1], strides = [1, 1]} : vector<8x2xf32> to vector<8x1xf32>
    %195 = tpu.transpose %194, [1, 0] : vector<8x1xf32> -> vector<1x8xf32>
    %196 = vector.broadcast %193 : vector<8x1xf32> to vector<8x8xf32>
    %197 = vector.broadcast %195 : vector<1x8xf32> to vector<8x8xf32>
    %198 = arith.addf %196, %197 : vector<8x8xf32>
    %cst_62 = arith.constant 0.000000e+00 : f32
    %199 = vector.broadcast %cst_62 : f32 to vector<8x8xf32>
    %200 = arith.cmpf ogt, %198, %199 : vector<8x8xf32>
    %cst_63 = arith.constant 2.000000e-01 : f32
    %201 = vector.broadcast %cst_63 : f32 to vector<8x8xf32>
    %202 = arith.mulf %201, %198 : vector<8x8xf32>
    %203 = arith.select %200, %198, %202 : vector<8x8xi1>, vector<8x8xf32>
    %cst_64 = arith.constant dense<0xFF800000> : vector<8xf32>
    %204 = vector.multi_reduction <maximumf>, %203, %cst_64 [1] : vector<8x8xf32> to vector<8xf32>
    %205 = vector.shape_cast %204 : vector<8xf32> to vector<8x1xf32>
    %206 = vector.broadcast %205 : vector<8x1xf32> to vector<8x8xf32>
    %207 = arith.subf %203, %206 : vector<8x8xf32>
    %208 = math.exp %207 : vector<8x8xf32>
    %cst_65 = arith.constant dense<0.000000e+00> : vector<8xf32>
    %209 = vector.multi_reduction <add>, %208, %cst_65 [1] : vector<8x8xf32> to vector<8xf32>
    %210 = vector.shape_cast %209 : vector<8xf32> to vector<8x1xf32>
    %211 = vector.broadcast %210 : vector<8x1xf32> to vector<8x8xf32>
    %212 = arith.divf %208, %211 : vector<8x8xf32>
    %cst_66 = arith.constant dense<0.000000e+00> : vector<8x32xf32>
    %213 = tpu.matmul %212, %190, %cst_66 {dimension_numbers = #tpu.dot_dimension_numbers<[1], [0], [0], [1], [0, 0, 1, 1], [], []>} : vector<8x8xf32>, vector<8x32xf32>, vector<8x32xf32> -> vector<8x32xf32>
    %214 = vector.broadcast %184 : f32 to vector<8x32xf32>
    %215 = arith.mulf %214, %190 : vector<8x32xf32>
    %216 = arith.addf %213, %215 : vector<8x32xf32>
    %cst_67 = arith.constant 0.000000e+00 : f32
    %217 = vector.broadcast %cst_67 : f32 to vector<8x32xf32>
    %218 = arith.minimumf %216, %217 : vector<8x32xf32>
    %cst_68 = arith.constant 5.000000e-01 : f32
    %219 = vector.broadcast %cst_68 : f32 to vector<8x32xf32>
    %220 = arith.mulf %219, %218 : vector<8x32xf32>
    %221 = math.tanh %220 : vector<8x32xf32>
    %222 = math.exp %218 : vector<8x32xf32>
    %cst_69 = arith.constant 1.000000e+00 : f32
    %223 = vector.broadcast %cst_69 : f32 to vector<8x32xf32>
    %224 = arith.addf %222, %223 : vector<8x32xf32>
    %225 = arith.mulf %221, %224 : vector<8x32xf32>
    %cst_70 = arith.constant 0.000000e+00 : f32
    %226 = vector.broadcast %cst_70 : f32 to vector<8x32xf32>
    %227 = arith.cmpf ogt, %216, %226 : vector<8x32xf32>
    %228 = arith.select %227, %216, %225 : vector<8x32xi1>, vector<8x32xf32>
    %229 = vector.extract_strided_slice %187 {offsets = [1, 0, 0], sizes = [1, 8, 32], strides = [1, 1, 1]} : vector<2x8x32xf32> to vector<1x8x32xf32>
    %230 = vector.shape_cast %229 : vector<1x8x32xf32> to vector<8x32xf32>
    %231 = vector.extract_strided_slice %188 {offsets = [1, 0, 0], sizes = [1, 8, 2], strides = [1, 1, 1]} : vector<2x8x2xf32> to vector<1x8x2xf32>
    %232 = vector.shape_cast %231 : vector<1x8x2xf32> to vector<8x2xf32>
    %233 = vector.extract_strided_slice %232 {offsets = [0, 0], sizes = [8, 1], strides = [1, 1]} : vector<8x2xf32> to vector<8x1xf32>
    %234 = vector.extract_strided_slice %232 {offsets = [0, 1], sizes = [8, 1], strides = [1, 1]} : vector<8x2xf32> to vector<8x1xf32>
    %235 = tpu.transpose %234, [1, 0] : vector<8x1xf32> -> vector<1x8xf32>
    %236 = vector.broadcast %233 : vector<8x1xf32> to vector<8x8xf32>
    %237 = vector.broadcast %235 : vector<1x8xf32> to vector<8x8xf32>
    %238 = arith.addf %236, %237 : vector<8x8xf32>
    %cst_71 = arith.constant 0.000000e+00 : f32
    %239 = vector.broadcast %cst_71 : f32 to vector<8x8xf32>
    %240 = arith.cmpf ogt, %238, %239 : vector<8x8xf32>
    %cst_72 = arith.constant 2.000000e-01 : f32
    %241 = vector.broadcast %cst_72 : f32 to vector<8x8xf32>
    %242 = arith.mulf %241, %238 : vector<8x8xf32>
    %243 = arith.select %240, %238, %242 : vector<8x8xi1>, vector<8x8xf32>
    %cst_73 = arith.constant dense<0xFF800000> : vector<8xf32>
    %244 = vector.multi_reduction <maximumf>, %243, %cst_73 [1] : vector<8x8xf32> to vector<8xf32>
    %245 = vector.shape_cast %244 : vector<8xf32> to vector<8x1xf32>
    %246 = vector.broadcast %245 : vector<8x1xf32> to vector<8x8xf32>
    %247 = arith.subf %243, %246 : vector<8x8xf32>
    %248 = math.exp %247 : vector<8x8xf32>
    %cst_74 = arith.constant dense<0.000000e+00> : vector<8xf32>
    %249 = vector.multi_reduction <add>, %248, %cst_74 [1] : vector<8x8xf32> to vector<8xf32>
    %250 = vector.shape_cast %249 : vector<8xf32> to vector<8x1xf32>
    %251 = vector.broadcast %250 : vector<8x1xf32> to vector<8x8xf32>
    %252 = arith.divf %248, %251 : vector<8x8xf32>
    %cst_75 = arith.constant dense<0.000000e+00> : vector<8x32xf32>
    %253 = tpu.matmul %252, %230, %cst_75 {dimension_numbers = #tpu.dot_dimension_numbers<[1], [0], [0], [1], [0, 0, 1, 1], [], []>} : vector<8x8xf32>, vector<8x32xf32>, vector<8x32xf32> -> vector<8x32xf32>
    %254 = vector.broadcast %184 : f32 to vector<8x32xf32>
    %255 = arith.mulf %254, %230 : vector<8x32xf32>
    %256 = arith.addf %253, %255 : vector<8x32xf32>
    %cst_76 = arith.constant 0.000000e+00 : f32
    %257 = vector.broadcast %cst_76 : f32 to vector<8x32xf32>
    %258 = arith.minimumf %256, %257 : vector<8x32xf32>
    %cst_77 = arith.constant 5.000000e-01 : f32
    %259 = vector.broadcast %cst_77 : f32 to vector<8x32xf32>
    %260 = arith.mulf %259, %258 : vector<8x32xf32>
    %261 = math.tanh %260 : vector<8x32xf32>
    %262 = math.exp %258 : vector<8x32xf32>
    %cst_78 = arith.constant 1.000000e+00 : f32
    %263 = vector.broadcast %cst_78 : f32 to vector<8x32xf32>
    %264 = arith.addf %262, %263 : vector<8x32xf32>
    %265 = arith.mulf %261, %264 : vector<8x32xf32>
    %cst_79 = arith.constant 0.000000e+00 : f32
    %266 = vector.broadcast %cst_79 : f32 to vector<8x32xf32>
    %267 = arith.cmpf ogt, %256, %266 : vector<8x32xf32>
    %268 = arith.select %267, %256, %265 : vector<8x32xi1>, vector<8x32xf32>
    %c3 = arith.constant 3 : index
    %c0_80 = arith.constant 0 : index
    %c0_81 = arith.constant 0 : index
    %269 = vector.load %arg3[%c3, %c0_80, %c0_81] : memref<4x32x32xf32, #tpu.memory_space<vmem>>, vector<1x32x32xf32>
    %270 = vector.shape_cast %269 : vector<1x32x32xf32> to vector<32x32xf32>
    %c3_82 = arith.constant 3 : index
    %c0_83 = arith.constant 0 : index
    %c0_84 = arith.constant 0 : index
    %271 = vector.load %arg4[%c3_82, %c0_83, %c0_84] : memref<4x32x2xf32, #tpu.memory_space<vmem>>, vector<1x32x2xf32>
    %272 = vector.shape_cast %271 : vector<1x32x2xf32> to vector<32x2xf32>
    %c3_85 = arith.constant 3 : index
    %273 = memref.load %arg1[%c3_85] : memref<4xf32, #tpu.memory_space<smem>>
    %cst_86 = arith.constant dense<0.000000e+00> : vector<16x32xf32>
    %274 = tpu.matmul %1, %270, %cst_86 {dimension_numbers = #tpu.dot_dimension_numbers<[1], [0], [0], [1], [0, 0, 1, 1], [], []>} : vector<16x32xf32>, vector<32x32xf32>, vector<16x32xf32> -> vector<16x32xf32>
    %cst_87 = arith.constant dense<0.000000e+00> : vector<16x2xf32>
    %275 = tpu.matmul %274, %272, %cst_87 {dimension_numbers = #tpu.dot_dimension_numbers<[1], [0], [0], [1], [0, 0, 1, 1], [], []>} : vector<16x32xf32>, vector<32x2xf32>, vector<16x2xf32> -> vector<16x2xf32>
    %276 = vector.shape_cast %274 : vector<16x32xf32> to vector<2x8x32xf32>
    %277 = vector.shape_cast %275 : vector<16x2xf32> to vector<2x8x2xf32>
    %278 = vector.extract_strided_slice %276 {offsets = [0, 0, 0], sizes = [1, 8, 32], strides = [1, 1, 1]} : vector<2x8x32xf32> to vector<1x8x32xf32>
    %279 = vector.shape_cast %278 : vector<1x8x32xf32> to vector<8x32xf32>
    %280 = vector.extract_strided_slice %277 {offsets = [0, 0, 0], sizes = [1, 8, 2], strides = [1, 1, 1]} : vector<2x8x2xf32> to vector<1x8x2xf32>
    %281 = vector.shape_cast %280 : vector<1x8x2xf32> to vector<8x2xf32>
    %282 = vector.extract_strided_slice %281 {offsets = [0, 0], sizes = [8, 1], strides = [1, 1]} : vector<8x2xf32> to vector<8x1xf32>
    %283 = vector.extract_strided_slice %281 {offsets = [0, 1], sizes = [8, 1], strides = [1, 1]} : vector<8x2xf32> to vector<8x1xf32>
    %284 = tpu.transpose %283, [1, 0] : vector<8x1xf32> -> vector<1x8xf32>
    %285 = vector.broadcast %282 : vector<8x1xf32> to vector<8x8xf32>
    %286 = vector.broadcast %284 : vector<1x8xf32> to vector<8x8xf32>
    %287 = arith.addf %285, %286 : vector<8x8xf32>
    %cst_88 = arith.constant 0.000000e+00 : f32
    %288 = vector.broadcast %cst_88 : f32 to vector<8x8xf32>
    %289 = arith.cmpf ogt, %287, %288 : vector<8x8xf32>
    %cst_89 = arith.constant 2.000000e-01 : f32
    %290 = vector.broadcast %cst_89 : f32 to vector<8x8xf32>
    %291 = arith.mulf %290, %287 : vector<8x8xf32>
    %292 = arith.select %289, %287, %291 : vector<8x8xi1>, vector<8x8xf32>
    %cst_90 = arith.constant dense<0xFF800000> : vector<8xf32>
    %293 = vector.multi_reduction <maximumf>, %292, %cst_90 [1] : vector<8x8xf32> to vector<8xf32>
    %294 = vector.shape_cast %293 : vector<8xf32> to vector<8x1xf32>
    %295 = vector.broadcast %294 : vector<8x1xf32> to vector<8x8xf32>
    %296 = arith.subf %292, %295 : vector<8x8xf32>
    %297 = math.exp %296 : vector<8x8xf32>
    %cst_91 = arith.constant dense<0.000000e+00> : vector<8xf32>
    %298 = vector.multi_reduction <add>, %297, %cst_91 [1] : vector<8x8xf32> to vector<8xf32>
    %299 = vector.shape_cast %298 : vector<8xf32> to vector<8x1xf32>
    %300 = vector.broadcast %299 : vector<8x1xf32> to vector<8x8xf32>
    %301 = arith.divf %297, %300 : vector<8x8xf32>
    %cst_92 = arith.constant dense<0.000000e+00> : vector<8x32xf32>
    %302 = tpu.matmul %301, %279, %cst_92 {dimension_numbers = #tpu.dot_dimension_numbers<[1], [0], [0], [1], [0, 0, 1, 1], [], []>} : vector<8x8xf32>, vector<8x32xf32>, vector<8x32xf32> -> vector<8x32xf32>
    %303 = vector.broadcast %273 : f32 to vector<8x32xf32>
    %304 = arith.mulf %303, %279 : vector<8x32xf32>
    %305 = arith.addf %302, %304 : vector<8x32xf32>
    %cst_93 = arith.constant 0.000000e+00 : f32
    %306 = vector.broadcast %cst_93 : f32 to vector<8x32xf32>
    %307 = arith.minimumf %305, %306 : vector<8x32xf32>
    %cst_94 = arith.constant 5.000000e-01 : f32
    %308 = vector.broadcast %cst_94 : f32 to vector<8x32xf32>
    %309 = arith.mulf %308, %307 : vector<8x32xf32>
    %310 = math.tanh %309 : vector<8x32xf32>
    %311 = math.exp %307 : vector<8x32xf32>
    %cst_95 = arith.constant 1.000000e+00 : f32
    %312 = vector.broadcast %cst_95 : f32 to vector<8x32xf32>
    %313 = arith.addf %311, %312 : vector<8x32xf32>
    %314 = arith.mulf %310, %313 : vector<8x32xf32>
    %cst_96 = arith.constant 0.000000e+00 : f32
    %315 = vector.broadcast %cst_96 : f32 to vector<8x32xf32>
    %316 = arith.cmpf ogt, %305, %315 : vector<8x32xf32>
    %317 = arith.select %316, %305, %314 : vector<8x32xi1>, vector<8x32xf32>
    %318 = vector.extract_strided_slice %276 {offsets = [1, 0, 0], sizes = [1, 8, 32], strides = [1, 1, 1]} : vector<2x8x32xf32> to vector<1x8x32xf32>
    %319 = vector.shape_cast %318 : vector<1x8x32xf32> to vector<8x32xf32>
    %320 = vector.extract_strided_slice %277 {offsets = [1, 0, 0], sizes = [1, 8, 2], strides = [1, 1, 1]} : vector<2x8x2xf32> to vector<1x8x2xf32>
    %321 = vector.shape_cast %320 : vector<1x8x2xf32> to vector<8x2xf32>
    %322 = vector.extract_strided_slice %321 {offsets = [0, 0], sizes = [8, 1], strides = [1, 1]} : vector<8x2xf32> to vector<8x1xf32>
    %323 = vector.extract_strided_slice %321 {offsets = [0, 1], sizes = [8, 1], strides = [1, 1]} : vector<8x2xf32> to vector<8x1xf32>
    %324 = tpu.transpose %323, [1, 0] : vector<8x1xf32> -> vector<1x8xf32>
    %325 = vector.broadcast %322 : vector<8x1xf32> to vector<8x8xf32>
    %326 = vector.broadcast %324 : vector<1x8xf32> to vector<8x8xf32>
    %327 = arith.addf %325, %326 : vector<8x8xf32>
    %cst_97 = arith.constant 0.000000e+00 : f32
    %328 = vector.broadcast %cst_97 : f32 to vector<8x8xf32>
    %329 = arith.cmpf ogt, %327, %328 : vector<8x8xf32>
    %cst_98 = arith.constant 2.000000e-01 : f32
    %330 = vector.broadcast %cst_98 : f32 to vector<8x8xf32>
    %331 = arith.mulf %330, %327 : vector<8x8xf32>
    %332 = arith.select %329, %327, %331 : vector<8x8xi1>, vector<8x8xf32>
    %cst_99 = arith.constant dense<0xFF800000> : vector<8xf32>
    %333 = vector.multi_reduction <maximumf>, %332, %cst_99 [1] : vector<8x8xf32> to vector<8xf32>
    %334 = vector.shape_cast %333 : vector<8xf32> to vector<8x1xf32>
    %335 = vector.broadcast %334 : vector<8x1xf32> to vector<8x8xf32>
    %336 = arith.subf %332, %335 : vector<8x8xf32>
    %337 = math.exp %336 : vector<8x8xf32>
    %cst_100 = arith.constant dense<0.000000e+00> : vector<8xf32>
    %338 = vector.multi_reduction <add>, %337, %cst_100 [1] : vector<8x8xf32> to vector<8xf32>
    %339 = vector.shape_cast %338 : vector<8xf32> to vector<8x1xf32>
    %340 = vector.broadcast %339 : vector<8x1xf32> to vector<8x8xf32>
    %341 = arith.divf %337, %340 : vector<8x8xf32>
    %cst_101 = arith.constant dense<0.000000e+00> : vector<8x32xf32>
    %342 = tpu.matmul %341, %319, %cst_101 {dimension_numbers = #tpu.dot_dimension_numbers<[1], [0], [0], [1], [0, 0, 1, 1], [], []>} : vector<8x8xf32>, vector<8x32xf32>, vector<8x32xf32> -> vector<8x32xf32>
    %343 = vector.broadcast %273 : f32 to vector<8x32xf32>
    %344 = arith.mulf %343, %319 : vector<8x32xf32>
    %345 = arith.addf %342, %344 : vector<8x32xf32>
    %cst_102 = arith.constant 0.000000e+00 : f32
    %346 = vector.broadcast %cst_102 : f32 to vector<8x32xf32>
    %347 = arith.minimumf %345, %346 : vector<8x32xf32>
    %cst_103 = arith.constant 5.000000e-01 : f32
    %348 = vector.broadcast %cst_103 : f32 to vector<8x32xf32>
    %349 = arith.mulf %348, %347 : vector<8x32xf32>
    %350 = math.tanh %349 : vector<8x32xf32>
    %351 = math.exp %347 : vector<8x32xf32>
    %cst_104 = arith.constant 1.000000e+00 : f32
    %352 = vector.broadcast %cst_104 : f32 to vector<8x32xf32>
    %353 = arith.addf %351, %352 : vector<8x32xf32>
    %354 = arith.mulf %350, %353 : vector<8x32xf32>
    %cst_105 = arith.constant 0.000000e+00 : f32
    %355 = vector.broadcast %cst_105 : f32 to vector<8x32xf32>
    %356 = arith.cmpf ogt, %345, %355 : vector<8x32xf32>
    %357 = arith.select %356, %345, %354 : vector<8x32xi1>, vector<8x32xf32>
    %358 = tpu.concatenate %50, %139, %228, %317 in 1 : vector<8x32xf32>, vector<8x32xf32>, vector<8x32xf32>, vector<8x32xf32> -> vector<8x128xf32>
    %c0_106 = arith.constant 0 : index
    %c0_107 = arith.constant 0 : index
    %c0_108 = arith.constant 0 : index
    %359 = vector.load %arg5[%c0_106, %c0_107, %c0_108] : memref<2x8x128xf32, #tpu.memory_space<vmem>>, vector<1x8x128xf32>
    %360 = vector.shape_cast %359 : vector<1x8x128xf32> to vector<8x128xf32>
    %361 = vector.shape_cast %358 : vector<8x128xf32> to vector<1x8x128xf32>
    tpu.vector_store %arg5[%c0_106, %c0_107, %c0_108], %361 {strides = array<i32>} : memref<2x8x128xf32, #tpu.memory_space<vmem>>, vector<1x8x128xf32>,
    %362 = tpu.concatenate %90, %179, %268, %357 in 1 : vector<8x32xf32>, vector<8x32xf32>, vector<8x32xf32>, vector<8x32xf32> -> vector<8x128xf32>
    %c1_109 = arith.constant 1 : index
    %c0_110 = arith.constant 0 : index
    %c0_111 = arith.constant 0 : index
    %363 = vector.load %arg5[%c1_109, %c0_110, %c0_111] : memref<2x8x128xf32, #tpu.memory_space<vmem>>, vector<1x8x128xf32>
    %364 = vector.shape_cast %363 : vector<1x8x128xf32> to vector<8x128xf32>
    %365 = vector.shape_cast %362 : vector<8x128xf32> to vector<1x8x128xf32>
    tpu.vector_store %arg5[%c1_109, %c0_110, %c0_111], %365 {strides = array<i32>} : memref<2x8x128xf32, #tpu.memory_space<vmem>>, vector<1x8x128xf32>,
    return
  }
  func.func @transform_0(%arg0: i32) -> i32 {
    %c0_i32 = arith.constant 0 : i32
    %c0_i32_0 = arith.constant 0 : i32
    return %c0_i32 : i32
  }
  func.func @transform_1(%arg0: i32) -> (i32, i32, i32) {
    %c0_i32 = arith.constant 0 : i32
    %c0_i32_0 = arith.constant 0 : i32
    %c0_i32_1 = arith.constant 0 : i32
    return %arg0, %c0_i32, %c0_i32_0 : i32, i32, i32
  }
  func.func @transform_2(%arg0: i32) -> (i32, i32, i32) {
    %c0_i32 = arith.constant 0 : i32
    %c0_i32_0 = arith.constant 0 : i32
    %c0_i32_1 = arith.constant 0 : i32
    %c0_i32_2 = arith.constant 0 : i32
    return %c0_i32, %c0_i32_0, %c0_i32_1 : i32, i32, i32
  }
  func.func @transform_3(%arg0: i32) -> (i32, i32, i32) {
    %c0_i32 = arith.constant 0 : i32
    %c0_i32_0 = arith.constant 0 : i32
    %c0_i32_1 = arith.constant 0 : i32
    %c0_i32_2 = arith.constant 0 : i32
    return %c0_i32, %c0_i32_0, %c0_i32_1 : i32, i32, i32
  }
  func.func @transform_4(%arg0: i32) -> (i32, i32, i32) {
    %c0_i32 = arith.constant 0 : i32
    %c0_i32_0 = arith.constant 0 : i32
    %c0_i32_1 = arith.constant 0 : i32
    return %arg0, %c0_i32, %c0_i32_0 : i32, i32, i32
  }
}

</mosaic_0001>

<bundles_post_ra>
// kernel: tpu_custom_call.1
= control target key start
LH: loop header
LB: loop body
LE: loop exit
PB: predicated region body
PF: predicated region fallthrough
CT: control target
= control target key end

     0   :  { %9 = vsyncpa [#allocation5], 0  ;;  %s3267_s0 = inlined_call_operand.vmem [shape: f32[4], index: 0, kind: input, shape index: {}]   ;;  %s3268_s1 = inlined_call_operand.hbm [shape: f32[4,8,32], index: 1, kind: input, shape index: {}]   ;;  %s3269_s2 = inlined_call_operand.vmem [shape: f32[4,32,32], index: 2, kind: input, shape index: {}]   ;;  %s3270_s3 = inlined_call_operand.vmem [shape: f32[4,32,2], index: 3, kind: input, shape index: {}]   ;;  %s3271_s4 = inlined_call_operand.hbm [shape: f32[4,8,128], index: 4, kind: output, shape index: {}]  }
   0x1   :  { %10 = vsyncpa [#allocation3], 0 }
   0x2   :  { %12 = vsyncpa [#allocation3 + $0x1], 0 }
   0x3   :  { %13 = vsyncpa [#allocation4], 0 }
   0x4   :  { %15 = vsyncpa [#allocation4 + $0x1], 0  ;;  %s2798_s15 = smov 0   ;;  %s2800_s16 = smov 0  }
   0x5   :  { %s2802_s17 = smov 0   ;;  %s2804_s18 = smov 0  }
   0x6 LB: > { %s2819_s19 = sadd.s32 4294967295, %s2757_s18   ;;  %s2182_s20 = sadd.s32 4294967294, %s2757_s18   ;;  %s2757_s18 = sphi %s2804_s18, %s3291_s18   ;;  %s2753_s17 = sphi %s2802_s17, %s3290_s17   ;;  %s2749_s16 = sphi %s2800_s16, %s3289_s16   ;;  %s2745_s15 = sphi %s2798_s15, %s3288_s15  }
   0x7   : > { %s2823_s21 = sadd.s32 1, %s2757_s18   ;;  %s49_s22 = sadd.s32 1, %s2753_s17 }
   0x8   : > { %s46_s23 = ssub.s32 %s2757_s18, %s2823_s21  ;;  %p56_p0 = scmp.ne.s32.totalorder %s2753_s17, %s2749_s16 }
   0x9   : > { %p47_p1 = scmp.eq.s32.totalorder %s46_s23, 0  ;;  %p57_p2 = scmp.eq.s32.totalorder %s2757_s18, 0 }
   0xa   : > { %p62_p3 = scmp.ne.s32.totalorder %s2749_s16, %s2745_s15  ;;  %p3273_p4 = scmp.eq.s32.totalorder %s2819_s19, 0 }
   0xb   : > { %s2835_s24 = scalar_select %p47_p1, %s2753_s17, %s49_s22  }
   0xc   : > { %p2837_p5 = por %p57_p2, %p56_p0  ;;  %p2843_p6 = por %p3273_p4, %p62_p3 }
   0xd   : > { %p128_p7 = scmp.eq.s32.totalorder %s2819_s19, 1  ;;  %p134_p8 = scmp.eq.s32.totalorder %s2182_s20, 1 }
   0xe   : > { %s3276_s26 = scalar_select %p2843_p6, 1, 0 }
   0xf   : > { %p2183_p9 = scmp.ge.s32.totalorder %s2757_s18, 1  ;;  %p141_p10 = scmp.lt.s32.totalorder %s2757_s18, 3 }
  0x10   : > { %p2850_p11 = por %p128_p7, %p56_p0  ;;  %p2854_p12 = por %p134_p8, %p62_p3 }
  0x11   : > { %p2858_p13 = pnand %p2183_p9, %p141_p10  ;;  %s154_s6 = sshll.u32 %s3267_s0, 4  ;;  %s155_s6 = int_to_ptr.vmem [resolvable:$true] %s154_s6 }
  0x12   : > { %s3277_s27 = scalar_select %p2850_p11, 1, 0 }
  0x13   : > { %s3278_s28 = scalar_select %p2854_p12, 1, 0 }
  0x14   : > { %p2516_p1 = pneg %p2858_p13  ;;  %p2529_p2 = scmp.lt.s32.totalorder %s2757_s18, 2 }
  0x15   : > { %s171_s8 = sand.u32 1, %s2753_s17   ;;  %s2642_s11 = scalar_lea.vmem %s155_s6, 16 }
  0x16   : > { %p2871_p7 = pnand %p2516_p1, %p3273_p4  ;;  %p2878_p3 = pnand %p2529_p2, %p2837_p5 }
  0x17   : > { %s2186_s10 = sshll.u32 %s171_s8, 4  ;;  %p2643_p8 = scmp.ne.s32.totalorder %s155_s6, %s2642_s11 }
  0x18   : > { %p2644_p9 = pneg %p2871_p7  ;;  %p2650_p12 = scmp.lt.s32.totalorder %s155_s6, %s155_s6 }
  0x19   : > { %p2651_p11 = scmp.lt.s32.totalorder %s2642_s11, %s2642_s11 }
  0x1a   : > { %p2645_p10 = pnand %p2644_p9, %p2643_p8 }
  0x1b   : > { %p2652_p1 = por %p2651_p11, %p2650_p12 }
  0x1c   : > { %p2646_p0 = pneg %p2645_p10 }
  0x1e   : > { %p2653_p4 = pnand %p2652_p1, %p2646_p0 }
  0x20   : > { %2656 = shalt.err (!%p2653_p4)
}
  0x21   : > { %s2759_s12 = smov [#allocation2]   ;;  %s2250_s13 = sshll.u32 %s2757_s18, 8 }
  0x22   : > { %2519 = dma.vmem_to_smem (!%p2871_p7), %s155_s6, 16, %s2759_s12, [#allocation5]  }
  0x23   : > { %s175_s14 = scalar_lea.vmem [#allocation6], %s2186_s10  ;;  %s2890_s25 = scalar_lea.hbm %s3268_s1, %s2250_s13 }
  0x24   : > { %s182_s20 = sshll.u32 %s175_s14, 4  ;;  %s2894_s30 = scalar_lea.sflag [#allocation3], %s171_s8  ;;  %s2892_s20 = int_to_ptr.vmem [resolvable:$true] %s182_s20 }
  0x25   : > { %s2657_s5 = scalar_lea.hbm %s2890_s25, 256  ;;  %p2659_p5 = pneg %p2878_p3 }
  0x26   : > { %p2658_p4 = scmp.ne.s32.totalorder %s2890_s25, %s2657_s5  ;;  %s2662_s10 = scalar_lea.hbm %s3268_s1, 512 }
  0x27   : > { %p2663_p0 = scmp.lt.u32.totalorder %s2890_s25, %s3268_s1  ;;  %p2664_p2 = scmp.lt.u32.totalorder %s2662_s10, %s2657_s5 }
  0x28   : > { %p2660_p11 = pnand %p2659_p5, %p2658_p4  ;;  %p2666_p8 = scmp.lt.u32.totalorder %s2657_s5, %s2890_s25 }
  0x29   : > { %p2665_p7 = por %p2664_p2, %p2663_p0 }
  0x2a   : > { %p2661_p12 = pneg %p2660_p11 }
  0x2b   : > { %p2667_p9 = por %p2666_p8, %p2665_p7 }
  0x2d   : > { %p2668_p10 = pnand %p2667_p9, %p2661_p12 }
  0x2f   : > { %2671 = shalt.err (!%p2668_p10)
}
  0x30   : > { %s2672_s8 = scalar_lea.vmem %s2892_s20, 256  ;;  %s2760_s13 = smov [#allocation6]  }
  0x31   : > { %p2673_p1 = scmp.ne.s32.totalorder %s2892_s20, %s2672_s8  ;;  %s2677_s14 = sshll.u32 %s2760_s13, 4  ;;  %s2678_s14 = int_to_ptr.vmem [resolvable:$false] %s2677_s14 }
  0x32   : > { %s2679_s22 = scalar_lea.vmem %s2678_s14, 512  ;;  %p2680_p6 = scmp.lt.s32.totalorder %s2892_s20, %s2678_s14 }
  0x33   : > { %p2675_p4 = pnand %p2673_p1, %p2659_p5  ;;  %p2681_p0 = scmp.lt.s32.totalorder %s2679_s22, %s2672_s8 }
  0x35   : > { %p2676_p11 = pneg %p2675_p4  ;;  %p2682_p2 = por %p2681_p0, %p2680_p6 }
  0x37   : > { %p2683_p7 = pnand %p2682_p2, %p2676_p11 }
  0x39   : > { %2686 = shalt.err (!%p2683_p7)
}
  0x3a   : > { %s2761_s23 = smov 128   ;;  %s2762_s5 = smov 8  }
  0x3b   : > { %2523 = dma.hbm_to_vmem [thread:$0]  (!%p2878_p3), %s2890_s25, 256, %s2892_s20, %s2894_s30, %s2761_s23, %s2761_s23, %s2762_s5  }
  0x3c   : > { %194 = sbr.rel (%p2858_p13) target bundleno = 4839 (0x12e7), region = 36  ;;  %p3282_p5 = scmp.eq.s32.totalorder (!%p2858_p13), %s2819_s19, 0 }
  0x43   : > { %2732 = dma.done.wait (%p3282_p5), [#allocation5], 16   ;;  %p3283_p12 = pmov %p3282_p5 }
  0x44   : > { %s2929_s6 = sand.u32 1, %s2749_s16   ;;  %p3284_p6 = scmp.ne.s32.totalorder %s3276_s26, 0 }
  0x45   : > { %2734 = vsyncadd (%p3283_p12), [#allocation5], 4294967280  ;;  %s2191_s7 = sshll.u32 %s2929_s6, 4  ;;  %s201_s10 = scalar_lea.sflag [#allocation3], %s2929_s6 }
  0x46   : > { %s204_s9 = scalar_lea.vmem [#allocation6], %s2191_s7 }
  0x47   : > { %2736 = dma.done.wait (%p3284_p6), %s201_s10, 256  }
  0x48   : > { %2738 = vsyncadd (%p3284_p6), %s201_s10, 4294967040 }
  0x49   : > { %209 = sfence }
  0x4a   : > { %v234_v0 = vld [vmem:[%s3269_s2] sm:$0xff]  ;;  %v235_v1 = vld [vmem:[%s3269_s2 + $0x8] sm:$0xff]  ;;  %v236_v2 = vld [vmem:[%s3269_s2 + $0x10] sm:$0xff]  ;;  %vm243_vm0 = vcmask 261120   ;;  %v2763_v14 = vmov 0.0   ;;  %v2764_v17 = vmov 0   ;;  %v446_v21 = vlaneseq }
  0x4b   : > { %v2444_v3 = vpack.c.bf16 %v235_v1, %v234_v0  ;;  %v237_v4 = vld [vmem:[%s3269_s2 + $0x18] sm:$0xff]  ;;  %v2951_v5 = vld [vmem:[%s204_s9] sm:$0xff]  ;;  %v239_v8 = vld [vmem:[%s3270_s3 + $0x8] sm:$0xff]  ;;  %2576 = vset.pattern.permute.xlu0 %v2764_v17  ;;  %vm454_vm2 = vcmask 64512   ;;  %vm2766_vm3 = vmmov 0   ;;  %s3016_s22 = sld [smem:[#allocation2]] }
  0x4c   : > { %v2448_v6 = vpack.c.bf16 %v237_v4, %v236_v2  ;;  %2324 = vmatprep.mubr.msk.f32.mxu0 %vm243_vm0, %v2951_v5  ;;  %v238_v7 = vld [vmem:[%s3270_s3] sm:$0xff]  ;;  %v240_v9 = vld [vmem:[%s3270_s3 + $0x10] sm:$0xff]  ;;  %v241_v11 = vld [vmem:[%s3270_s3 + $0x18] sm:$0xff]  ;;  %v447_v22 = vshrl.u32 %v446_v21, 7  ;;  %s2207_s30 = sld [smem:[#allocation2 + $0x1]]  ;;  %s3086_s11 = sld [smem:[#allocation2 + $0x2]] }
  0x4d   : > { %2445 = vmatprep.subr.bf16.mxu0 %v2444_v3  ;;  %v2452_v10 = vpack.c.bf16 %v239_v8, %v238_v7  ;;  %v2456_v12 = vpack.c.bf16 %v241_v11, %v240_v9  ;;  %v2967_v13 = vld [vmem:[%s204_s9 + $0x8] sm:$0xff]  ;;  %s2765_s9 = smov 127   ;;  %v2199_v40 = vld [vmem:[%s3269_s2 + $0x20] sm:$0xff]  ;;  %v2201_v43 = vld [vmem:[%s3269_s2 + $0x30] sm:$0xff]  ;;  %s2237_s5 = sld [smem:[#allocation2 + $0x3]] }
  0x4e   : > { %2447 = vmatpush3.bf16.msra.mxu0 %v2444_v3  ;;  %v2984_v23 = vsub.s32 0, %v447_v22  ;;  %v2200_v41 = vld [vmem:[%s3269_s2 + $0x28] sm:$0xff]  ;;  %v2202_v44 = vld [vmem:[%s3269_s2 + $0x38] sm:$0xff]  ;;  %v2203_v63 = vld [vmem:[%s3270_s3 + $0x20] sm:$0xff]  ;;  %s2769_s10 = smov 96   ;;  %s229_s29 = scalar_lea.vmem [#allocation7], %s2191_s7 }
  0x4f   : > { %2449 = vmatprep.subr.bf16.mxu0 %v2448_v6  ;;  %2453 = vmatprep.subr.bf16.mxu1 %v2452_v10  ;;  %v2460_v42 = vpack.c.bf16 %v2200_v41, %v2199_v40  ;;  %v2464_v45 = vpack.c.bf16 %v2202_v44, %v2201_v43  ;;  %v2204_v0 = vld [vmem:[%s3270_s3 + $0x28] sm:$0xff]  ;;  %v2206_v7 = vld [vmem:[%s3270_s3 + $0x38] sm:$0xff]  ;;  %s2097_s20 = sshll.u32 %s229_s29, 4  ;;  %s2251_s25 = sshll.u32 %s2819_s19, 8  ;;  %s3215_s20 = int_to_ptr.vmem [resolvable:$true] %s2097_s20 }
  0x50   : > { %2455 = vmatpush3.bf16.msra.mxu1 %v2452_v10  ;;  %v2468_v1 = vpack.c.bf16 %v2204_v0, %v2203_v63  ;;  %s3221_s12 = scalar_lea.hbm %s3271_s4, %s2251_s25  ;;  %s2084_s19 = scalar_lea.sflag [#allocation4], %s2929_s6 }
  0x51   : > { %2457 = vmatprep.subr.bf16.mxu1 %v2456_v12  ;;  %v466_v53 = vstv %s3016_s22  ;;  %s2687_s8 = scalar_lea.vmem %s3215_s20, 256  ;;  %p3285_p3 = scmp.ne.s32.totalorder %s3277_s27, 0 }
  0x52   : > { %2451 = vmatpush3.bf16.msra.mxu0 %v2448_v6  ;;  %v2205_v6 = vld [vmem:[%s3270_s3 + $0x30] sm:$0xff]  ;;  %v1370_v0 = vstv %s3086_s11  ;;  %s2768_s11 = smov 32   ;;  %p2688_p13 = scmp.ne.s32.totalorder %s3215_s20, %s2687_s8 }
  0x53   : > { %2338 = vmatprep.subr.mxu0 %v2763_v14  ;;  %v2472_v10 = vpack.c.bf16 %v2206_v7, %v2205_v6  ;;  %s2770_s13 = smov [#allocation7]  }
  0x54   : > { %2459 = vmatpush3.bf16.msra.mxu1 %v2456_v12  ;;  %p2689_p8 = pnand %p2688_p13, %p3285_p3  ;;  %s2691_s26 = sshll.u32 %s2770_s13, 4  ;;  %s2692_s26 = int_to_ptr.vmem [resolvable:$false] %s2691_s26 }
  0x55   : > { %2325 = vmatmul.mubr.msk.f32.vlgmr.msra.gmra.mrb[0].mxu0 %vm243_vm0, %v2967_v13  ;;  %2343 = vmatprep.subr.mxu1 %v2763_v14  ;;  %s2693_s14 = scalar_lea.vmem %s2692_s26, 512  ;;  %p2694_p10 = scmp.lt.s32.totalorder %s3215_s20, %s2692_s26 }
  0x56   : > { %2340 = vmatprep.mubr.msk.f32.mxu0 %vm2766_vm3, %v2763_v14  ;;  %p2690_p9 = pneg %p2689_p8  ;;  %p2695_p1 = scmp.lt.s32.totalorder %s2693_s14, %s2687_s8 }
  0x58   : > { %p2696_p4 = por %p2695_p1, %p2694_p10 }
  0x5a   : > { %p2697_p11 = pnand %p2696_p4, %p2690_p9 }
 0x128   : > { %v2973_v15 = vpop.f32.mrb[0].mxu0 }
 0x129   : > { %v2975_v16 = vpop.f32.mrb[1].mxu0  ;;  %v609_v11 = vmul.f32 %v2973_v15, %v466_v53 }
 0x12a   : > { %2335 = vmatprep.mubr.msk.f32.mxu1 %vm243_vm0, %v2975_v16  ;;  %2339 = vmatpush3.msra.mxu0 %v2975_v16  ;;  %v467_v54 = vmul.f32 %v466_v53, %v2975_v16 }
 0x12b   : > { %2336 = vmatmul.mubr.msk.f32.vlgmr.msra.gmra.mrb[0].mxu1 %vm243_vm0, %v2973_v15  ;;  %2461 = vmatprep.subr.bf16.mxu0 %v2460_v42 }
 0x12c   : > { %2344 = vmatpush3.msra.mxu1 %v2973_v15  ;;  %2345 = vmatprep.mubr.msk.f32.mxu1 %vm2766_vm3, %v2763_v14 }
 0x12d   : > { %2469 = vmatprep.subr.bf16.mxu1 %v2468_v1 }
 0x1fe   : > { %v2337_v18 = vpop.f32.mrb[0].mxu1 }
 0x1ff   : > { %v397_v19 = vpop.f32.mrb[1].mxu1 }
 0x200   : > { %407 = vrot.lane.b32.xlu0 %v397_v19, %s2765_s9 }
 0x204   : > { %443 = vperm.xlu0 %2576, %v397_v19  }
 0x272   : > { %v408_v20 = vpop.permute.xlu0 %407 }
 0x273   : > { %410 = vxpose.xlu1.b32.start.end [1/1] (short) (narrow) %v408_v20, 8 }
 0x283   : > { %v444_v26 = vpop.permute.xlu0 %443 }
 0x291   : > { %2577 = vset.pattern.permute.xlu1 %v2764_v17 }
 0x2f3   : > { %v426_v24 = vpop.trf.xlu1 }
 0x2f4   : > { %v449_v25 = vrot.slane %v426_v24, %v2984_v23 }
 0x2f6   : > { %v450_v27 = vadd.f32 %v449_v25, %v444_v26 }
 0x2f8   : > { %vm451_vm1 = vcmp.gt.f32.partialorder %v450_v27, 0.0  ;;  %v452_v28 = vmul.f32 0.2, %v450_v27 }
 0x2fa   : > { %v453_v29 = vsel %vm451_vm1, %v450_v27, %v452_v28 }
 0x2fb   : > { %v455_v30 = vsel %vm454_vm2, %v453_v29, -inf }
 0x2fc   : > { %456 = vmax.xlane.f32.xlu1 %v455_v30 }
 0x30d   : > { %587 = vperm.xlu1 %2577, %v2337_v18  }
 0x389   : > { %v457_v31 = vpop.xlane.xlu1 %456 }
 0x38a   : > { %v458_v32 = vsub.f32 %v453_v29, %v457_v31 }
 0x38c   : > { %v459_v33 = vmul.f32 1.442695, %v458_v32 }
 0x38d   : > { %v588_v46 = vpop.permute.xlu1 %587 }
 0x38e   : > { %2578 = vpow2.f32 %v459_v33 }
 0x398   : > { %v2579_v34 = vpop.eup %2578 }
 0x399   : > { %v461_v35 = vsel %vm454_vm2, %v2579_v34, 0.0 }
 0x39a   : > { %462 = vadd.xlane.f32.xlu0 %v461_v35  ;;  %v2215_v35 = vld [vmem:[%s3269_s2 + $0x48] sm:$0xff] }
 0x3b0   : > { %551 = vrot.lane.b32.xlu0 %v2337_v18, %s2765_s9 }
 0x427   : > { %v463_v36 = vpop.xlane.xlu0 %462 }
 0x428   : > { %2580 = vrcp.f32 %v463_v36 }
 0x42b   : > { %v552_v37 = vpop.permute.xlu0 %551 }
 0x42c   : > { %554 = vxpose.xlu1.b32.start.end [1/1] (short) (narrow) %v552_v37, 8 }
 0x432   : > { %v2581_v38 = vpop.eup %2580 }
 0x433   : > { %v465_v39 = vmul.f32 %v2581_v38, %v2579_v34  ;;  %v2214_v34 = vld [vmem:[%s3269_s2 + $0x40] sm:$0xff] }
 0x434   : > { %v2476_v36 = vpack.c.bf16 %v2215_v35, %v2214_v34  ;;  %v2229_v35 = vld [vmem:[%s3269_s2 + $0x60] sm:$0xff] }
 0x435   : > { %2341 = vmatmul.mubr.msk.f32.vlgmr.msra.gmra.mrb[2].mxu0 %vm454_vm2, %v465_v39 }
 0x436   : > { %2356 = vmatprep.mubr.msk.f32.mxu0 %vm243_vm0, %v2951_v5  ;;  %2463 = vmatpush3.bf16.msra.mxu0 %v2460_v42 }
 0x437   : > { %2465 = vmatprep.subr.bf16.mxu0 %v2464_v45 }
 0x43a   : > { %2467 = vmatpush3.bf16.msra.mxu0 %v2464_v45  ;;  %v2216_v45 = vld [vmem:[%s3269_s2 + $0x50] sm:$0xff] }
 0x43b   : > { %2370 = vmatprep.subr.mxu0 %v2763_v14 }
 0x43d   : > { %2357 = vmatmul.mubr.msk.f32.vlgmr.msra.gmra.mrb[4].mxu0 %vm243_vm0, %v2967_v13 }
 0x43e   : > { %2372 = vmatprep.mubr.msk.f32.mxu0 %vm2766_vm3, %v2763_v14 }
 0x4ac   : > { %v570_v47 = vpop.trf.xlu1 }
 0x4ad   : > { %v593_v48 = vrot.slane %v570_v47, %v2984_v23 }
 0x4af   : > { %v594_v49 = vadd.f32 %v593_v48, %v588_v46  ;;  %v2217_v46 = vld [vmem:[%s3269_s2 + $0x58] sm:$0xff] }
 0x4b1   : > { %vm595_vm4 = vcmp.gt.f32.partialorder %v594_v49, 0.0  ;;  %v596_v50 = vmul.f32 0.2, %v594_v49 }
 0x4b3   : > { %v597_v51 = vsel %vm595_vm4, %v594_v49, %v596_v50  ;;  %v2480_v49 = vpack.c.bf16 %v2217_v46, %v2216_v45  ;;  %v2231_v45 = vld [vmem:[%s3269_s2 + $0x70] sm:$0xff]  ;;  %v2232_v46 = vld [vmem:[%s3269_s2 + $0x78] sm:$0xff]  ;;  %vm2063_vm4 = vcmask 785408  }
 0x4b4   : > { %v598_v52 = vsel %vm454_vm2, %v597_v51, -inf }
 0x4b5   : > { %599 = vmax.xlane.f32.xlu0 %v598_v52 }
 0x508   : > { %v537_v55 = vpop.f32.mrb[2].mxu0 }
 0x509   : > { %v3020_v56 = vadd.f32 %v537_v55, %v467_v54  ;;  %v2342_v57 = vpop.f32.mrb[3].mxu0  ;;  %v2218_v55 = vld [vmem:[%s3270_s3 + $0x40] sm:$0xff] }
 0x50a   : > { %v2219_v57 = vld [vmem:[%s3270_s3 + $0x48] sm:$0xff] }
 0x510   : > { %v3029_v2 = vpop.f32.mrb[4].mxu0 }
 0x511   : > { %v3031_v3 = vpop.f32.mrb[5].mxu0 }
 0x512   : > { %2371 = vmatpush3.msra.mxu0 %v3031_v3 }
 0x513   : > { %2477 = vmatprep.subr.bf16.mxu0 %v2476_v36 }
 0x542   : > { %v600_v58 = vpop.xlane.xlu0 %599 }
 0x543   : > { %v601_v59 = vsub.f32 %v597_v51, %v600_v58  ;;  %v2484_v58 = vpack.c.bf16 %v2219_v57, %v2218_v55  ;;  %v2234_v57 = vld [vmem:[%s3270_s3 + $0x68] sm:$0xff] }
 0x545   : > { %v602_v60 = vmul.f32 1.442695, %v601_v59  ;;  %v918_v59 = vstv %s2207_s30 }
 0x547   : > { %2582 = vpow2.f32 %v602_v60  ;;  %v919_v60 = vmul.f32 %v918_v59, %v3031_v3 }
 0x551   : > { %v2583_v61 = vpop.eup %2582 }
 0x552   : > { %v604_v62 = vsel %vm454_vm2, %v2583_v61, 0.0 }
 0x553   : > { %605 = vadd.xlane.f32.xlu0 %v604_v62 }
 0x5e0   : > { %v606_v4 = vpop.xlane.xlu0 %605 }
 0x5e1   : > { %2584 = vrcp.f32 %v606_v4 }
 0x5eb   : > { %v2585_v8 = vpop.eup %2584 }
 0x5ec   : > { %v608_v9 = vmul.f32 %v2585_v8, %v2583_v61  ;;  %v2220_v8 = vld [vmem:[%s3270_s3 + $0x50] sm:$0xff] }
 0x5ee   : > { %2346 = vmatmul.mubr.msk.f32.vlgmr.msra.gmra.mrb[2].mxu1 %vm454_vm2, %v608_v9 }
 0x5ef   : > { %2471 = vmatpush3.bf16.msra.mxu1 %v2468_v1  ;;  %2367 = vmatprep.mubr.msk.f32.mxu1 %vm243_vm0, %v3031_v3  ;;  %v2221_v3 = vld [vmem:[%s3270_s3 + $0x58] sm:$0xff] }
 0x5f0   : > { %2473 = vmatprep.subr.bf16.mxu1 %v2472_v10 }
 0x5f3   : > { %2475 = vmatpush3.bf16.msra.mxu1 %v2472_v10 }
 0x5f4   : > { %2375 = vmatprep.subr.mxu1 %v2763_v14 }
 0x5f6   : > { %2368 = vmatmul.mubr.msk.f32.vlgmr.msra.gmra.mrb[4].mxu1 %vm243_vm0, %v3029_v2 }
 0x5f7   : > { %2376 = vmatpush3.msra.mxu1 %v3029_v2  ;;  %2377 = vmatprep.mubr.msk.f32.mxu1 %vm2766_vm3, %v2763_v14 }
 0x5f8   : > { %2485 = vmatprep.subr.bf16.mxu1 %v2484_v58 }
 0x6c1   : > { %v679_v12 = vpop.f32.mrb[2].mxu1 }
 0x6c2   : > { %v3050_v16 = vadd.f32 %v679_v12, %v609_v11  ;;  %v2347_v17 = vpop.f32.mrb[3].mxu1  ;;  %v2488_v11 = vpack.c.bf16 %v2221_v3, %v2220_v8  ;;  %v1061_v12 = vmul.f32 %v3029_v2, %v918_v59  ;;  %v2235_v8 = vld [vmem:[%s3270_s3 + $0x70] sm:$0xff] }
 0x6c9   : > { %v2369_v18 = vpop.f32.mrb[4].mxu1 }
 0x6ca   : > { %v850_v19 = vpop.f32.mrb[5].mxu1 }
 0x6cb   : > { %896 = vperm.xlu1 %2577, %v850_v19   ;;  %860 = vrot.lane.b32.xlu0 %v850_v19, %s2765_s9 }
 0x73d   : > { %v861_v20 = vpop.permute.xlu0 %860 }
 0x73e   : > { %863 = vxpose.xlu0.b32.start.end [1/1] (short) (narrow) %v861_v20, 8 }
 0x74a   : > { %v897_v24 = vpop.permute.xlu1 %896 }
 0x7be   : > { %v879_v21 = vpop.trf.xlu0 }
 0x7bf   : > { %v902_v22 = vrot.slane %v879_v21, %v2984_v23 }
 0x7c1   : > { %v903_v25 = vadd.f32 %v902_v22, %v897_v24 }
 0x7c3   : > { %vm904_vm5 = vcmp.gt.f32.partialorder %v903_v25, 0.0  ;;  %v905_v26 = vmul.f32 0.2, %v903_v25 }
 0x7c5   : > { %v906_v27 = vsel %vm904_vm5, %v903_v25, %v905_v26  ;;  %vm690_vm5 = vcmp.gt.f32.partialorder %v3050_v16, 0.0 }
 0x7c6   : > { %v907_v15 = vsel %vm454_vm2, %v906_v27, -inf }
 0x7c7   : > { %908 = vmax.xlane.f32.xlu1 %v907_v15 }
 0x7d8   : > { %1003 = vrot.lane.b32.xlu1 %v2369_v18, %s2765_s9 }
 0x7dc   : > { %1039 = vperm.xlu1 %2577, %v2369_v18  }
 0x854   : > { %v909_v28 = vpop.xlane.xlu1 %908 }
 0x855   : > { %v910_v29 = vsub.f32 %v906_v27, %v909_v28 }
 0x857   : > { %v911_v30 = vmul.f32 1.442695, %v910_v29 }
 0x858   : > { %v1004_v31 = vpop.permute.xlu1 %1003 }
 0x859   : > { %2586 = vpow2.f32 %v911_v30  ;;  %1006 = vxpose.xlu1.b32.start.end [1/1] (short) (narrow) %v1004_v31, 8 }
 0x85c   : > { %v1040_v37 = vpop.permute.xlu1 %1039 }
 0x863   : > { %v2587_v32 = vpop.eup %2586 }
 0x864   : > { %v913_v33 = vsel %vm454_vm2, %v2587_v32, 0.0 }
 0x865   : > { %914 = vadd.xlane.f32.xlu0 %v913_v33 }
 0x8d9   : > { %v1022_v38 = vpop.trf.xlu1 }
 0x8da   : > { %v1045_v39 = vrot.slane %v1022_v38, %v2984_v23 }
 0x8dc   : > { %v1046_v40 = vadd.f32 %v1045_v39, %v1040_v37 }
 0x8de   : > { %vm1047_vm6 = vcmp.gt.f32.partialorder %v1046_v40, 0.0  ;;  %v1048_v41 = vmul.f32 0.2, %v1046_v40 }
 0x8e0   : > { %v1049_v42 = vsel %vm1047_vm6, %v1046_v40, %v1048_v41 }
 0x8e1   : > { %v1050_v43 = vsel %vm454_vm2, %v1049_v42, -inf }
 0x8e2   : > { %1051 = vmax.xlane.f32.xlu0 %v1050_v43 }
 0x8f2   : > { %v915_v44 = vpop.xlane.xlu0 %914 }
 0x8f3   : > { %2588 = vrcp.f32 %v915_v44 }
 0x8fd   : > { %v2589_v47 = vpop.eup %2588 }
 0x8fe   : > { %v917_v48 = vmul.f32 %v2589_v47, %v2587_v32 }
 0x900   : > { %2373 = vmatmul.mubr.msk.f32.vlgmr.msra.gmra.mrb[6].mxu0 %vm454_vm2, %v917_v48 }
 0x901   : > { %2479 = vmatpush3.bf16.msra.mxu0 %v2476_v36  ;;  %2388 = vmatprep.mubr.msk.f32.mxu0 %vm243_vm0, %v2951_v5  ;;  %v2230_v36 = vld [vmem:[%s3269_s2 + $0x68] sm:$0xff] }
 0x902   : > { %2481 = vmatprep.subr.bf16.mxu0 %v2480_v49  ;;  %v2492_v37 = vpack.c.bf16 %v2230_v36, %v2229_v35 }
 0x905   : > { %2483 = vmatpush3.bf16.msra.mxu0 %v2480_v49 }
 0x906   : > { %2402 = vmatprep.subr.mxu0 %v2763_v14 }
 0x908   : > { %2389 = vmatmul.mubr.msk.f32.vlgmr.msra.gmra.mrb[8].mxu0 %vm243_vm0, %v2967_v13 }
 0x909   : > { %2404 = vmatprep.mubr.msk.f32.mxu0 %vm2766_vm3, %v2763_v14 }
 0x96f   : > { %v1052_v50 = vpop.xlane.xlu0 %1051 }
 0x970   : > { %v1053_v51 = vsub.f32 %v1049_v42, %v1052_v50  ;;  %v2496_v50 = vpack.c.bf16 %v2232_v46, %v2231_v45 }
 0x972   : > { %v1054_v52 = vmul.f32 1.442695, %v1053_v51 }
 0x974   : > { %2590 = vpow2.f32 %v1054_v52 }
 0x97e   : > { %v2591_v53 = vpop.eup %2590 }
 0x97f   : > { %v1056_v54 = vsel %vm454_vm2, %v2591_v53, 0.0 }
 0x980   : > { %1057 = vadd.xlane.f32.xlu0 %v1056_v54 }
 0x9d3   : > { %v989_v61 = vpop.f32.mrb[6].mxu0 }
 0x9d4   : > { %v3089_v62 = vadd.f32 %v989_v61, %v919_v60  ;;  %v2374_v63 = vpop.f32.mrb[7].mxu0 }
 0x9d6   : > { %v993_v46 = vmin.f32 %v3089_v62, 0.0  ;;  %vm1000_vm12 = vcmp.gt.f32.partialorder %v3089_v62, 0.0 }
 0x9db   : > { %v2390_v1 = vpop.f32.mrb[8].mxu0 }
 0x9dc   : > { %v3092_v4 = vpop.f32.mrb[9].mxu0  ;;  %v3096_v6 = vmul.f32 %v2390_v1, %v1370_v0 }
 0x9dd   : > { %2403 = vmatpush3.msra.mxu0 %v3092_v4 }
 0x9de   : > { %2493 = vmatprep.subr.bf16.mxu0 %v2492_v37 }
 0xa0d   : > { %v1058_v7 = vpop.xlane.xlu0 %1057 }
 0xa0e   : > { %2592 = vrcp.f32 %v1058_v7 }
 0xa18   : > { %v2593_v9 = vpop.eup %2592 }
 0xa19   : > { %v1060_v10 = vmul.f32 %v2593_v9, %v2591_v53 }
 0xa1b   : > { %2378 = vmatmul.mubr.msk.f32.vlgmr.msra.gmra.mrb[6].mxu1 %vm454_vm2, %v1060_v10 }
 0xa1c   : > { %2487 = vmatpush3.bf16.msra.mxu1 %v2484_v58  ;;  %2399 = vmatprep.mubr.msk.f32.mxu1 %vm243_vm0, %v3092_v4  ;;  %v1371_v58 = vmul.f32 %v1370_v0, %v3092_v4  ;;  %v2236_v0 = vld [vmem:[%s3270_s3 + $0x78] sm:$0xff] }
 0xa1d   : > { %2489 = vmatprep.subr.bf16.mxu1 %v2488_v11  ;;  %v2504_v9 = vpack.c.bf16 %v2236_v0, %v2235_v8 }
 0xa20   : > { %2491 = vmatpush3.bf16.msra.mxu1 %v2488_v11 }
 0xa21   : > { %2407 = vmatprep.subr.mxu1 %v2763_v14 }
 0xa23   : > { %2400 = vmatmul.mubr.msk.f32.vlgmr.msra.gmra.mrb[8].mxu1 %vm243_vm0, %v2390_v1 }
 0xa24   : > { %2408 = vmatpush3.msra.mxu1 %v2390_v1  ;;  %2409 = vmatprep.mubr.msk.f32.mxu1 %vm2766_vm3, %v2763_v14 }
 0xaee   : > { %v1131_v17 = vpop.f32.mrb[6].mxu1 }
 0xaef   : > { %v3113_v18 = vadd.f32 %v1131_v17, %v1061_v12  ;;  %v2379_v19 = vpop.f32.mrb[7].mxu1 }
 0xaf1   : > { %vm1142_vm13 = vcmp.gt.f32.partialorder %v3113_v18, 0.0 }
 0xaf6   : > { %v2401_v20 = vpop.f32.mrb[8].mxu1 }
 0xaf7   : > { %v1302_v21 = vpop.f32.mrb[9].mxu1 }
 0xaf8   : > { %1312 = vrot.lane.b32.xlu0 %v1302_v21, %s2765_s9 }
 0xafc   : > { %1348 = vperm.xlu0 %2576, %v1302_v21  }
 0xb6a   : > { %v1313_v22 = vpop.permute.xlu0 %1312 }
 0xb6b   : > { %1315 = vxpose.xlu1.b32.start.end [1/1] (short) (narrow) %v1313_v22, 8 }
 0xb7b   : > { %v1349_v26 = vpop.permute.xlu0 %1348 }
 0xbeb   : > { %v1331_v24 = vpop.trf.xlu1 }
 0xbec   : > { %v1354_v25 = vrot.slane %v1331_v24, %v2984_v23 }
 0xbee   : > { %v1355_v27 = vadd.f32 %v1354_v25, %v1349_v26 }
 0xbf0   : > { %vm1356_vm7 = vcmp.gt.f32.partialorder %v1355_v27, 0.0  ;;  %v1357_v15 = vmul.f32 0.2, %v1355_v27 }
 0xbf2   : > { %v1358_v28 = vsel %vm1356_vm7, %v1355_v27, %v1357_v15 }
 0xbf3   : > { %v1359_v2 = vsel %vm454_vm2, %v1358_v28, -inf }
 0xbf4   : > { %1360 = vmax.xlane.f32.xlu0 %v1359_v2 }
 0xc0a   : > { %1455 = vrot.lane.b32.xlu0 %v2401_v20, %s2765_s9 }
 0xc81   : > { %v1361_v29 = vpop.xlane.xlu0 %1360 }
 0xc82   : > { %v1362_v30 = vsub.f32 %v1358_v28, %v1361_v29 }
 0xc84   : > { %v1363_v31 = vmul.f32 1.442695, %v1362_v30 }
 0xc85   : > { %v1456_v32 = vpop.permute.xlu0 %1455 }
 0xc86   : > { %2594 = vpow2.f32 %v1363_v31  ;;  %1458 = vxpose.xlu0.b32.start.end [1/1] (short) (narrow) %v1456_v32, 8 }
 0xc90   : > { %v2595_v33 = vpop.eup %2594 }
 0xc91   : > { %v1365_v34 = vsel %vm454_vm2, %v2595_v33, 0.0 }
 0xc92   : > { %1366 = vadd.xlane.f32.xlu1 %v1365_v34 }
 0xca3   : > { %1491 = vperm.xlu1 %2577, %v2401_v20  }
 0xd06   : > { %v1474_v38 = vpop.trf.xlu0 }
 0xd07   : > { %v1497_v40 = vrot.slane %v1474_v38, %v2984_v23 }
 0xd1f   : > { %v1367_v39 = vpop.xlane.xlu1 %1366 }
 0xd20   : > { %2596 = vrcp.f32 %v1367_v39 }
 0xd23   : > { %v1492_v41 = vpop.permute.xlu1 %1491 }
 0xd24   : > { %v1498_v42 = vadd.f32 %v1497_v40, %v1492_v41 }
 0xd26   : > { %v1500_v43 = vmul.f32 0.2, %v1498_v42  ;;  %vm1499_vm8 = vcmp.gt.f32.partialorder %v1498_v42, 0.0 }
 0xd28   : > { %v1501_v44 = vsel %vm1499_vm8, %v1498_v42, %v1500_v43 }
 0xd29   : > { %v1502_v47 = vsel %vm454_vm2, %v1501_v44, -inf }
 0xd2a   : > { %v2597_v48 = vpop.eup %2596  ;;  %1503 = vmax.xlane.f32.xlu1 %v1502_v47  ;;  %v996_v47 = vmul.f32 1.442695, %v993_v46 }
 0xd2b   : > { %v1369_v49 = vmul.f32 %v2597_v48, %v2595_v33  ;;  %v1135_v48 = vmin.f32 %v3113_v18, 0.0 }
 0xd2d   : > { %2405 = vmatmul.mubr.msk.f32.vlgmr.msra.gmra.mrb[10].mxu0 %vm454_vm2, %v1369_v49 }
 0xd2e   : > { %2495 = vmatpush3.bf16.msra.mxu0 %v2492_v37  ;;  %2420 = vmatprep.mubr.msk.f32.mxu0 %vm243_vm0, %v2951_v5  ;;  %v2233_v5 = vld [vmem:[%s3270_s3 + $0x60] sm:$0xff] }
 0xd2f   : > { %2497 = vmatprep.subr.bf16.mxu0 %v2496_v50 }
 0xd32   : > { %2499 = vmatpush3.bf16.msra.mxu0 %v2496_v50  ;;  %v1138_v50 = vmul.f32 1.442695, %v1135_v48 }
 0xd33   : > { %2434 = vmatprep.subr.mxu0 %v2763_v14 }
 0xd35   : > { %2421 = vmatmul.mubr.msk.f32.vlgmr.msra.gmra.mrb[12].mxu0 %vm243_vm0, %v2967_v13  ;;  %v2500_v13 = vpack.c.bf16 %v2234_v57, %v2233_v5 }
 0xd36   : > { %2436 = vmatprep.mubr.msk.f32.mxu0 %vm2766_vm3, %v2763_v14 }
 0xd37   : > { %2501 = vmatprep.subr.bf16.mxu1 %v2500_v13 }
 0xdb7   : > { %v1504_v51 = vpop.xlane.xlu1 %1503 }
 0xdb8   : > { %v1505_v52 = vsub.f32 %v1501_v44, %v1504_v51 }
 0xdba   : > { %v1506_v53 = vmul.f32 1.442695, %v1505_v52  ;;  %v994_v52 = vmul.f32 0.5, %v993_v46  ;;  %v683_v46 = vmin.f32 %v3050_v16, 0.0 }
 0xdbc   : > { %2598 = vpow2.f32 %v1506_v53 }
 0xdc6   : > { %v2599_v54 = vpop.eup %2598 }
 0xdc7   : > { %v1508_v55 = vsel %vm454_vm2, %v2599_v54, 0.0 }
 0xdc8   : > { %1509 = vadd.xlane.f32.xlu0 %v1508_v55  ;;  %v1136_v55 = vmul.f32 0.5, %v1135_v48  ;;  %v686_v48 = vmul.f32 1.442695, %v683_v46 }
 0xe00   : > { %v1441_v59 = vpop.f32.mrb[10].mxu0 }
 0xe01   : > { %v3152_v60 = vadd.f32 %v1441_v59, %v1371_v58  ;;  %v2406_v61 = vpop.f32.mrb[11].mxu0 }
 0xe03   : > { %v1445_v27 = vmin.f32 %v3152_v60, 0.0  ;;  %vm1452_vm11 = vcmp.gt.f32.partialorder %v3152_v60, 0.0 }
 0xe05   : > { %v1448_v31 = vmul.f32 1.442695, %v1445_v27  ;;  %v1446_v35 = vmul.f32 0.5, %v1445_v27 }
 0xe08   : > { %v3154_v63 = vpop.f32.mrb[12].mxu0 }
 0xe09   : > { %v3156_v1 = vpop.f32.mrb[13].mxu0 }
 0xe0a   : > { %2435 = vmatpush3.msra.mxu0 %v3156_v1 }
 0xe55   : > { %v1510_v7 = vpop.xlane.xlu0 %1509 }
 0xe56   : > { %2600 = vrcp.f32 %v1510_v7 }
 0xe57   : > { %2602 = vpow2.f32 %v1448_v31 }
 0xe58   : > { %2604 = vtanh.f32 %v1446_v35 }
 0xe60   : > { %v2601_v4 = vpop.eup %2600 }
 0xe61   : > { %v1512_v3 = vmul.f32 %v2601_v4, %v2599_v54  ;;  %v2603_v36 = vpop.eup %2602 }
 0xe62   : > { %v1450_v37 = vadd.f32 1.0, %v2603_v36 }
 0xe63   : > { %2410 = vmatmul.mubr.msk.f32.vlgmr.msra.gmra.mrb[10].mxu1 %vm454_vm2, %v1512_v3 }
 0xe64   : > { %2503 = vmatpush3.bf16.msra.mxu1 %v2500_v13  ;;  %2431 = vmatprep.mubr.msk.f32.mxu1 %vm243_vm0, %v3156_v1 }
 0xe65   : > { %2505 = vmatprep.subr.bf16.mxu1 %v2504_v9 }
 0xe68   : > { %2507 = vmatpush3.bf16.msra.mxu1 %v2504_v9 }
 0xe69   : > { %2439 = vmatprep.subr.mxu1 %v2763_v14 }
 0xe6b   : > { %2432 = vmatmul.mubr.msk.f32.vlgmr.msra.gmra.mrb[12].mxu1 %vm243_vm0, %v3154_v63 }
 0xe6c   : > { %2440 = vmatpush3.msra.mxu1 %v3154_v63  ;;  %2441 = vmatprep.mubr.msk.f32.mxu1 %vm2766_vm3, %v2763_v14  ;;  %vm2061_vm3 = vcmask 523264  }
 0xf36   : > { %v1583_v10 = vpop.f32.mrb[10].mxu1 }
 0xf37   : > { %v3175_v11 = vadd.f32 %v1583_v10, %v3096_v6  ;;  %v2411_v12 = vpop.f32.mrb[11].mxu1 }
 0xf39   : > { %vm1594_vm15 = vcmp.gt.f32.partialorder %v3175_v11, 0.0 }
 0xf3e   : > { %v2433_v17 = vpop.f32.mrb[12].mxu1 }
 0xf3f   : > { %v1754_v19 = vpop.f32.mrb[13].mxu1 }
 0xf40   : > { %1764 = vrot.lane.b32.xlu1 %v1754_v19, %s2765_s9 }
 0xf44   : > { %1907 = vrot.lane.b32.xlu1 %v2433_v17, %s2765_s9  ;;  %s2767_s9 = smov 64  }
 0xf48   : > { %1943 = vperm.xlu1 %2577, %v2433_v17  }
 0xf4c   : > { %1800 = vperm.xlu1 %2577, %v1754_v19   ;;  %v1587_v19 = vmin.f32 %v3175_v11, 0.0 }
 0xfb2   : > { %v1765_v20 = vpop.permute.xlu1 %1764 }
 0xfb3   : > { %1767 = vxpose.xlu1.b32.start.end [1/1] (short) (narrow) %v1765_v20, 8 }
 0xfb6   : > { %v1908_v21 = vpop.permute.xlu1 %1907 }
 0xfb7   : > { %1910 = vxpose.xlu0.b32.start.end [1/1] (short) (narrow) %v1908_v21, 8 }
 0xfc7   : > { %v1944_v22 = vpop.permute.xlu1 %1943 }
 0xfcb   : > { %v1801_v24 = vpop.permute.xlu1 %1800 }
0x1033   : > { %v1783_v14 = vpop.trf.xlu1 }
0x1034   : > { %v1806_v25 = vrot.slane %v1783_v14, %v2984_v23 }
0x1036   : > { %v1807_v6 = vadd.f32 %v1806_v25, %v1801_v24  ;;  %v1590_v24 = vmul.f32 1.442695, %v1587_v19 }
0x1037   : > { %v1926_v26 = vpop.trf.xlu0 }
0x1038   : > { %v1949_v15 = vrot.slane %v1926_v26, %v2984_v23  ;;  %vm1808_vm9 = vcmp.gt.f32.partialorder %v1807_v6, 0.0  ;;  %v1809_v28 = vmul.f32 0.2, %v1807_v6  ;;  %v2605_v23 = vpop.eup %2604 }
0x1039   : > { %v1451_v38 = vmul.f32 %v2605_v23, %v1450_v37 }
0x103a   : > { %v1950_v2 = vadd.f32 %v1949_v15, %v1944_v22  ;;  %v1810_v29 = vsel %vm1808_vm9, %v1807_v6, %v1809_v28 }
0x103b   : > { %v1811_v30 = vsel %vm454_vm2, %v1810_v29, -inf  ;;  %v1453_v39 = vsel %vm1452_vm11, %v3152_v60, %v1451_v38 }
0x103c   : > { %1812 = vmax.xlane.f32.xlu1 %v1811_v30  ;;  %vm1951_vm10 = vcmp.gt.f32.partialorder %v1950_v2, 0.0  ;;  %v1952_v32 = vmul.f32 0.2, %v1950_v2 }
0x103e   : > { %v1953_v33 = vsel %vm1951_vm10, %v1950_v2, %v1952_v32  ;;  %v1588_v2 = vmul.f32 0.5, %v1587_v19 }
0x103f   : > { %v1954_v34 = vsel %vm454_vm2, %v1953_v33, -inf }
0x1040   : > { %1955 = vmax.xlane.f32.xlu0 %v1954_v34 }
0x1056   : > { %2053 = vrot.lane.b32.xlu0 %v1453_v39, %s2767_s9 }
0x10c9   : > { %v1813_v40 = vpop.xlane.xlu1 %1812 }
0x10ca   : > { %v1814_v41 = vsub.f32 %v1810_v29, %v1813_v40 }
0x10cc   : > { %v1815_v42 = vmul.f32 1.442695, %v1814_v41 }
0x10cd   : > { %v1956_v43 = vpop.xlane.xlu0 %1955 }
0x10ce   : > { %2606 = vpow2.f32 %v1815_v42  ;;  %v1957_v44 = vsub.f32 %v1953_v33, %v1956_v43 }
0x10d0   : > { %v1958_v45 = vmul.f32 1.442695, %v1957_v44  ;;  %v541_v44 = vmin.f32 %v3020_v56, 0.0 }
0x10d2   : > { %2608 = vpow2.f32 %v1958_v45  ;;  %v544_v45 = vmul.f32 1.442695, %v541_v44 }
0x10d3   : > { %2610 = vpow2.f32 %v996_v47  ;;  %v542_v47 = vmul.f32 0.5, %v541_v44 }
0x10d4   : > { %2612 = vpow2.f32 %v1138_v50 }
0x10d5   : > { %2614 = vtanh.f32 %v994_v52 }
0x10d6   : > { %2616 = vtanh.f32 %v1136_v55 }
0x10d8   : > { %v2607_v49 = vpop.eup %2606 }
0x10d9   : > { %v1817_v51 = vsel %vm454_vm2, %v2607_v49, 0.0 }
0x10da   : > { %1818 = vadd.xlane.f32.xlu1 %v1817_v51 }
0x10dc   : > { %v2609_v53 = vpop.eup %2608 }
0x10dd   : > { %v1960_v54 = vsel %vm454_vm2, %v2609_v53, 0.0  ;;  %v2611_v5 = vpop.eup %2610 }
0x10de   : > { %1961 = vadd.xlane.f32.xlu1 %v1960_v54  ;;  %v998_v57 = vadd.f32 1.0, %v2611_v5  ;;  %v2613_v13 = vpop.eup %2612 }
0x10df   : > { %v2615_v58 = vpop.eup %2614  ;;  %v1140_v60 = vadd.f32 1.0, %v2613_v13 }
0x10e0   : > { %v999_v59 = vmul.f32 %v2615_v58, %v998_v57  ;;  %v2617_v61 = vpop.eup %2616 }
0x10e1   : > { %v1141_v8 = vmul.f32 %v2617_v61, %v1140_v60 }
0x10e2   : > { %v1001_v7 = vsel %vm1000_vm12, %v3089_v62, %v999_v59  ;;  %v1822_v62 = vstv %s2237_s5  ;;  %v2054_v59 = vpop.permute.xlu0 %2053 }
0x10e3   : > { %v1143_v0 = vsel %vm1142_vm13, %v3113_v18, %v1141_v8  ;;  %v1823_v20 = vmul.f32 %v1822_v62, %v3156_v1  ;;  %v1965_v25 = vmul.f32 %v3154_v63, %v1822_v62 }
0x10ef   : > { %2049 = vrot.lane.b32.xlu1 %v1001_v7, %s2768_s11 }
0x10f3   : > { %2067 = vrot.lane.b32.xlu1 %v1143_v0, %s2768_s11 }
0x1167   : > { %v1819_v4 = vpop.xlane.xlu1 %1818 }
0x1168   : > { %2618 = vrcp.f32 %v1819_v4 }
0x116b   : > { %v1962_v3 = vpop.xlane.xlu1 %1961 }
0x116c   : > { %2620 = vrcp.f32 %v1962_v3 }
0x116d   : > { %2622 = vpow2.f32 %v1590_v24 }
0x116f   : > { %v2050_v52 = vpop.permute.xlu1 %2049 }
0x1172   : > { %v2619_v9 = vpop.eup %2618 }
0x1173   : > { %v1821_v10 = vmul.f32 %v2619_v9, %v2607_v49  ;;  %v684_v49 = vmul.f32 0.5, %v683_v46  ;;  %v2068_v57 = vpop.permute.xlu1 %2067 }
0x1175   : > { %2437 = vmatmul.mubr.msk.f32.vlgmr.msra.gmra.mrb[14].mxu0 %vm454_vm2, %v1821_v10 }
0x1176   : > { %v2621_v12 = vpop.eup %2620 }
0x1177   : > { %v1964_v17 = vmul.f32 %v2621_v12, %v2609_v53  ;;  %v2623_v1 = vpop.eup %2622 }
0x1178   : > { %v1592_v34 = vadd.f32 1.0, %v2623_v1 }
0x1179   : > { %2442 = vmatmul.mubr.msk.f32.vlgmr.msra.gmra.mrb[14].mxu1 %vm454_vm2, %v1964_v17  ;;  %vm548_vm2 = vcmp.gt.f32.partialorder %v3020_v56, 0.0 }
0x1248   : > { %v1893_v18 = vpop.f32.mrb[14].mxu0 }
0x1249   : > { %v1894_v21 = vadd.f32 %v1893_v18, %v1823_v20  ;;  %v2438_v22 = vpop.f32.mrb[15].mxu0 }
0x124b   : > { %v1897_v14 = vmin.f32 %v1894_v21, 0.0  ;;  %vm1904_vm14 = vcmp.gt.f32.partialorder %v1894_v21, 0.0 }
0x124c   : > { %v2035_v6 = vpop.f32.mrb[14].mxu1 }
0x124d   : > { %v1900_v26 = vmul.f32 1.442695, %v1897_v14  ;;  %v2036_v27 = vadd.f32 %v2035_v6, %v1965_v25  ;;  %v2443_v15 = vpop.f32.mrb[15].mxu1  ;;  %v1898_v28 = vmul.f32 0.5, %v1897_v14 }
0x124f   : > { %v2039_v29 = vmin.f32 %v2036_v27, 0.0  ;;  %2624 = vpow2.f32 %v1900_v26  ;;  %vm2046_vm1 = vcmp.gt.f32.partialorder %v2036_v27, 0.0 }
0x1250   : > { %2626 = vtanh.f32 %v1898_v28 }
0x1251   : > { %v2042_v30 = vmul.f32 1.442695, %v2039_v29  ;;  %v2040_v31 = vmul.f32 0.5, %v2039_v29  ;;  %2628 = vtanh.f32 %v1588_v2 }
0x1253   : > { %2630 = vpow2.f32 %v2042_v30 }
0x1254   : > { %2632 = vtanh.f32 %v2040_v31 }
0x1255   : > { %2634 = vpow2.f32 %v544_v45 }
0x1256   : > { %2636 = vtanh.f32 %v542_v47 }
0x1257   : > { %2638 = vpow2.f32 %v686_v48 }
0x1258   : > { %2640 = vtanh.f32 %v684_v49 }
0x1259   : > { %v2625_v32 = vpop.eup %2624 }
0x125a   : > { %v1902_v33 = vadd.f32 1.0, %v2625_v32  ;;  %v2627_v63 = vpop.eup %2626 }
0x125b   : > { %v2629_v35 = vpop.eup %2628 }
0x125c   : > { %v1903_v36 = vmul.f32 %v2627_v63, %v1902_v33  ;;  %v1593_v38 = vmul.f32 %v2629_v35, %v1592_v34 }
0x125d   : > { %v2631_v37 = vpop.eup %2630 }
0x125e   : > { %v1905_v23 = vsel %vm1904_vm14, %v1894_v21, %v1903_v36  ;;  %v2044_v39 = vadd.f32 1.0, %v2631_v37  ;;  %v2633_v40 = vpop.eup %2632  ;;  %v1595_v42 = vsel %vm1594_vm15, %v3175_v11, %v1593_v38 }
0x125f   : > { %2057 = vrot.lane.b32.xlu1 %v1905_v23, %s2769_s10  ;;  %v2635_v50 = vpop.eup %2634 }
0x1260   : > { %v2045_v41 = vmul.f32 %v2633_v40, %v2044_v39  ;;  %v546_v51 = vadd.f32 1.0, %v2635_v50  ;;  %v2637_v11 = vpop.eup %2636 }
0x1261   : > { %v2639_v53 = vpop.eup %2638 }
0x1262   : > { %v2047_v43 = vsel %vm2046_vm1, %v2036_v27, %v2045_v41  ;;  %v547_v54 = vmul.f32 %v2637_v11, %v546_v51  ;;  %v688_v55 = vadd.f32 1.0, %v2639_v53  ;;  %v2641_v58 = vpop.eup %2640 }
0x1263   : > { %2071 = vrot.lane.b32.xlu1 %v1595_v42, %s2767_s9  ;;  %2075 = vrot.lane.b32.xlu0 %v2047_v43, %s2769_s10 }
0x1264   : > { %v549_v5 = vsel %vm548_vm2, %v3020_v56, %v547_v54  ;;  %v689_v60 = vmul.f32 %v2641_v58, %v688_v55 }
0x1265   : > { %v2060_v13 = vsel %vm243_vm0, %v549_v5, %v2050_v52 }
0x1266   : > { %v2062_v61 = vsel %vm2061_vm3, %v2060_v13, %v2054_v59  ;;  %v691_v56 = vsel %vm690_vm5, %v3050_v16, %v689_v60 }
0x1267   : > { %v2078_v0 = vsel %vm243_vm0, %v691_v56, %v2068_v57 }
0x12d1   : > { %v2058_v7 = vpop.permute.xlu1 %2057 }
0x12d2   : > { %v2064_v8 = vsel %vm2063_vm4, %v2062_v61, %v2058_v7 }
0x12d3   : > { %2065 = vst [vmem:[%s229_s29] sm:$0xff] %v2064_v8 }
0x12d5   : > { %v2076_v4 = vpop.permute.xlu0 %2075  ;;  %v2072_v3 = vpop.permute.xlu1 %2071 }
0x12d6   : > { %v2079_v9 = vsel %vm2061_vm3, %v2078_v0, %v2072_v3 }
0x12d7   : > { %v2080_v10 = vsel %vm2063_vm4, %v2079_v9, %v2076_v4 }
0x12d8   : > { %2244 = vst [vmem:[%s229_s29 + $0x8] sm:$0xff] %v2080_v10 }
0x12d9   : > { %2700 = shalt.err (!%p2697_p11)
}
0x12da   : > { %s2701_s22 = scalar_lea.hbm %s3221_s12, 256  ;;  %s2705_s11 = scalar_lea.hbm %s3271_s4, 512 }
0x12db   : > { %p2702_p0 = scmp.ne.s32.totalorder %s3221_s12, %s2701_s22  ;;  %p2706_p5 = scmp.lt.u32.totalorder %s3221_s12, %s3271_s4 }
0x12dc   : > { %p2707_p12 = scmp.lt.u32.totalorder %s2705_s11, %s2701_s22  ;;  %p2709_p13 = scmp.lt.u32.totalorder %s2701_s22, %s3221_s12 }
0x12dd   : > { %p2703_p2 = pnand %p2702_p0, %p3285_p3 }
0x12de   : > { %p2708_p6 = por %p2707_p12, %p2706_p5 }
0x12df   : > { %p2704_p7 = pneg %p2703_p2 }
0x12e0   : > { %p2710_p8 = por %p2709_p13, %p2708_p6 }
0x12e2   : > { %p2711_p9 = pnand %p2710_p8, %p2704_p7 }
0x12e4   : > { %2714 = shalt.err (!%p2711_p9)
}
0x12e5   : > { %s2771_s29 = smov 128   ;;  %s2772_s25 = smov 8  }
0x12e6   : > { %2514 = dma.vmem_to_hbm [thread:$0]  (%p3285_p3), %s3215_s20, 256, %s3221_s12, %s2084_s19, %s2771_s29, %s2771_s29, %s2772_s25  }
0x12e7 PF: > { %s2112_s7 = sand.u32 1, %s2745_s15   ;;  %p3286_p10 = scmp.ne.s32.totalorder %s3278_s28, 0 }
0x12e8   : > { %p3287_p1 = scmp.ge.s32.totalorder %s2757_s18, 2  ;;  %s2113_s30 = scalar_lea.sflag [#allocation4], %s2112_s7 }
0x12ea   : > { %p2525_p4 = pnand %p3287_p1, %p3286_p10 }
0x12ec   : > { %2740 = dma.done.wait (!%p2525_p4), %s2113_s30, 256  }
0x12ed   : > { %2742 = vsyncadd (!%p2525_p4), %s2113_s30, 4294967040  ;;  %p18_p11 = scmp.ge.s32.totalorder %s2823_s21, 4   ;;  %s3288_s15 = smov %s2749_s16 }
0x12ee   : > { %s3289_s16 = smov %s2753_s17  ;;  %s3290_s17 = smov %s2835_s24 }
0x12ef   : > { %s3291_s18 = smov %s2823_s21  ;;  %20 = sbr.rel (!%p18_p11) target bundleno = 6 (0x6), region = 93 }
0x12f6   :  { %2118 = vsyncpa [#allocation3], 1 }
0x12f7   :  { %2120 = vsyncpa [#allocation3 + $0x1], 1 }
0x12f8   :  { %2121 = vsyncpa [#allocation4], 1 }
0x12f9   :  { %2123 = vsyncpa [#allocation4 + $0x1], 1 }
0x12fa   :  { %2124 = vsyncpa [#allocation5], 1 }
0x12fb   :  { %2126 = vsyncpa [#allocation5 + $0x1], 1 }

</bundles_post_ra>
